<compile_context>
chip_gen: v7x
topology: tpu7x:2x2x1
jax: 0.10.0
libtpu: 0.0.40
codegen_flags: <defaults>
</compile_context>

<pallas_src>
import functools

import numpy as np
import jax
import jax.numpy as jnp
from jax.experimental import pallas as pl
from jax.experimental.pallas import tpu as pltpu


def _band_matrices(H, W, kernel=(1, 2, 1), normalize=True, flip=False):
    """Build band matrices so that (norm*L) @ x @ R == F.conv2d(x, outer(k,k)/sum,
    stride=1, padding=1, groups=C) applied to one (H, W) channel plane."""
    k = np.asarray(kernel, dtype=np.float64).reshape(-1)
    assert k.size == 3, "padding=1 preserves the spatial shape only for 3-tap kernels"
    norm = 1.0 / float(np.outer(k, k).sum()) if normalize else 1.0
    taps = k[::-1] if flip else k  # flipping the 2D kernel == reversing the 1D taps

    def band(n):
        # band[i, i-1], band[i, i], band[i, i+1] = taps; boundary rows simply drop the
        # out-of-range tap, which is exactly the zero-padding behaviour of padding=1.
        m = np.zeros((n, n), dtype=np.float64)
        idx = np.arange(n)
        m[idx, idx] = taps[1]
        if n > 1:
            m[idx[1:], idx[1:] - 1] = taps[0]
            m[idx[:-1], idx[:-1] + 1] = taps[2]
        return m

    L = band(H) * norm     # fold the normalization into L (exact: 1/16, 2/16)
    R = band(W).T
    return L.astype(np.float32), R.astype(np.float32)


def _blur_kernel(x_ref, l_ref, r_ref, o_ref, *, bc):
    # x_ref: (bc, H, W) block of independent channel planes.
    # l_ref: (H, H) left band matrix (H-direction pass, normalization folded in).
    # r_ref: (W, W) right band matrix (W-direction pass).
    l = l_ref[...]
    r = r_ref[...]
    for i in range(bc):  # static unroll; bc is small (<= 8)
        x = x_ref[i]  # (H, W), stays in the input dtype (no whole-block upcast)
        t = jnp.dot(l, x,
                    precision=jax.lax.Precision.HIGHEST,
                    preferred_element_type=jnp.float32).astype(x.dtype)
        y = jnp.dot(t, r,
                    precision=jax.lax.Precision.HIGHEST,
                    preferred_element_type=jnp.float32)
        o_ref[i] = y.astype(o_ref.dtype)


def blur_layer_forward(x_nchw, channels, kernel=(1, 2, 1), normalize=True, flip=False):
    """Pallas equivalent of BlurLayer.forward. x_nchw: (N, C, H, W) -> (N, C, H, W)."""
    N, C, H, W = x_nchw.shape
    assert C == channels

    L_np, R_np = _band_matrices(H, W, kernel, normalize, flip)
    L = jnp.asarray(L_np, dtype=x_nchw.dtype)
    R = jnp.asarray(R_np, dtype=x_nchw.dtype)

    P = N * C
    x_planes = x_nchw.reshape(P, H, W)  # metadata-only reshape (NCHW is contiguous)

    # Tile the grid over blocks of `bc` planes: target <= ~1 MiB of input per block so
    # double-buffered in+out blocks stay far below the scoped-VMEM limit on every
    # generation (incl. v7x's 64 MiB physical) while still pipelining DMA with compute.
    plane_bytes = H * W * x_nchw.dtype.itemsize
    bc = int(max(1, min(P, 8, (1 << 20) // max(1, plane_bytes))))
    grid = (pl.cdiv(P, bc),)

    out = pl.pallas_call(
        functools.partial(_blur_kernel, bc=bc),
        out_shape=jax.ShapeDtypeStruct((P, H, W), x_nchw.dtype),
        grid_spec=pltpu.PrefetchScalarGridSpec(
            num_scalar_prefetch=0,
            grid=grid,
            in_specs=[
                pl.BlockSpec((bc, H, W), lambda i: (i, 0, 0)),
                pl.BlockSpec((H, H), lambda i: (0, 0)),  # constant block -> fetched once
                pl.BlockSpec((W, W), lambda i: (0, 0)),  # constant block -> fetched once
            ],
            out_specs=pl.BlockSpec((bc, H, W), lambda i: (i, 0, 0)),
        ),
        compiler_params=pltpu.CompilerParams(
            dimension_semantics=("parallel",),  # lets v7x shard plane-blocks over 2 TCs
            vmem_limit_bytes=32 * 1024 * 1024,
        ),
    )(x_planes, L, R)

    return out.reshape(N, C, H, W)


def _reference_blur(x_nchw, channels, kernel=(1, 2, 1), normalize=True, flip=False):
    """Pure-JAX reference: explicit 9-tap depthwise conv in f32 (matches F.conv2d)."""
    k = np.asarray(kernel, dtype=np.float32).reshape(1, -1)
    k2d = k.T.dot(k)
    if normalize:
        k2d = k2d / k2d.sum()
    if flip:
        k2d = k2d[::-1, ::-1]
    N, C, H, W = x_nchw.shape
    xpad = jnp.pad(x_nchw.astype(jnp.float32), ((0, 0), (0, 0), (1, 1), (1, 1)))
    out = jnp.zeros((N, C, H, W), dtype=jnp.float32)
    for dh in range(3):
        for dw in range(3):
            out = out + float(k2d[dh, dw]) * xpad[:, :, dh:dh + H, dw:dw + W]
    return out.astype(x_nchw.dtype)


if __name__ == "__main__":
    key = jax.random.PRNGKey(0)
    N, C, H, W = 2, 4, 16, 16
    x = jax.random.normal(key, (N, C, H, W), dtype=jnp.float32)

    out = blur_layer_forward(x, channels=C)
    out = jax.block_until_ready(out)

    ref = _reference_blur(x, channels=C)
    assert out.shape == (N, C, H, W)
    np.testing.assert_allclose(np.asarray(out), np.asarray(ref), rtol=1e-4, atol=1e-4)

    print("KERNEL_OK")
</pallas_src>

<mosaic_0001>
module attributes {stable_mosaic.version = 11 : i64} {
  func.func @_blur_kernel(%arg0: i32, %arg1: memref<8x16x16xf32, #tpu.memory_space<vmem>>, %arg2: memref<16x16xf32, #tpu.memory_space<vmem>>, %arg3: memref<16x16xf32, #tpu.memory_space<vmem>>, %arg4: memref<8x16x16xf32, #tpu.memory_space<vmem>>) attributes {dimension_semantics = [#tpu.dimension_semantics<parallel>], iteration_bounds = array<i64: 1>, scalar_prefetch = 0 : i64, scratch_operands = 0 : i64, tpu.core_type = #tpu.core_type<tc>, window_params = [{transform_indices = @transform_0, window_bounds = array<i64: 8, 16, 16>}, {pipeline_mode = #tpu.pipeline_mode<synchronous>, transform_indices = @transform_1, window_bounds = array<i64: 16, 16>}, {pipeline_mode = #tpu.pipeline_mode<synchronous>, transform_indices = @transform_2, window_bounds = array<i64: 16, 16>}, {transform_indices = @transform_3, window_bounds = array<i64: 8, 16, 16>}]} {
    %c0 = arith.constant 0 : index
    %c0_0 = arith.constant 0 : index
    %0 = vector.load %arg2[%c0, %c0_0] : memref<16x16xf32, #tpu.memory_space<vmem>>, vector<16x16xf32>
    %c0_1 = arith.constant 0 : index
    %c0_2 = arith.constant 0 : index
    %1 = vector.load %arg3[%c0_1, %c0_2] : memref<16x16xf32, #tpu.memory_space<vmem>>, vector<16x16xf32>
    %c0_3 = arith.constant 0 : index
    %c0_4 = arith.constant 0 : index
    %c0_5 = arith.constant 0 : index
    %2 = vector.load %arg1[%c0_3, %c0_4, %c0_5] : memref<8x16x16xf32, #tpu.memory_space<vmem>>, vector<1x16x16xf32>
    %3 = vector.shape_cast %2 : vector<1x16x16xf32> to vector<16x16xf32>
    %cst = arith.constant dense<0.000000e+00> : vector<16x16xf32>
    %4 = tpu.matmul %0, %3, %cst {dimension_numbers = #tpu.dot_dimension_numbers<[1], [0], [0], [1], [0, 0, 1, 1], [], []>, precision = #tpu.contract_precision<fp32>} : vector<16x16xf32>, vector<16x16xf32>, vector<16x16xf32> -> vector<16x16xf32>
    %cst_6 = arith.constant dense<0.000000e+00> : vector<16x16xf32>
    %5 = tpu.matmul %4, %1, %cst_6 {dimension_numbers = #tpu.dot_dimension_numbers<[1], [0], [0], [1], [0, 0, 1, 1], [], []>, precision = #tpu.contract_precision<fp32>} : vector<16x16xf32>, vector<16x16xf32>, vector<16x16xf32> -> vector<16x16xf32>
    %c0_7 = arith.constant 0 : index
    %c0_8 = arith.constant 0 : index
    %c0_9 = arith.constant 0 : index
    %6 = vector.load %arg4[%c0_7, %c0_8, %c0_9] : memref<8x16x16xf32, #tpu.memory_space<vmem>>, vector<1x16x16xf32>
    %7 = vector.shape_cast %6 : vector<1x16x16xf32> to vector<16x16xf32>
    %8 = vector.shape_cast %5 : vector<16x16xf32> to vector<1x16x16xf32>
    tpu.vector_store %arg4[%c0_7, %c0_8, %c0_9], %8 {strides = array<i32>} : memref<8x16x16xf32, #tpu.memory_space<vmem>>, vector<1x16x16xf32>,
    %c1 = arith.constant 1 : index
    %c0_10 = arith.constant 0 : index
    %c0_11 = arith.constant 0 : index
    %9 = vector.load %arg1[%c1, %c0_10, %c0_11] : memref<8x16x16xf32, #tpu.memory_space<vmem>>, vector<1x16x16xf32>
    %10 = vector.shape_cast %9 : vector<1x16x16xf32> to vector<16x16xf32>
    %cst_12 = arith.constant dense<0.000000e+00> : vector<16x16xf32>
    %11 = tpu.matmul %0, %10, %cst_12 {dimension_numbers = #tpu.dot_dimension_numbers<[1], [0], [0], [1], [0, 0, 1, 1], [], []>, precision = #tpu.contract_precision<fp32>} : vector<16x16xf32>, vector<16x16xf32>, vector<16x16xf32> -> vector<16x16xf32>
    %cst_13 = arith.constant dense<0.000000e+00> : vector<16x16xf32>
    %12 = tpu.matmul %11, %1, %cst_13 {dimension_numbers = #tpu.dot_dimension_numbers<[1], [0], [0], [1], [0, 0, 1, 1], [], []>, precision = #tpu.contract_precision<fp32>} : vector<16x16xf32>, vector<16x16xf32>, vector<16x16xf32> -> vector<16x16xf32>
    %c1_14 = arith.constant 1 : index
    %c0_15 = arith.constant 0 : index
    %c0_16 = arith.constant 0 : index
    %13 = vector.load %arg4[%c1_14, %c0_15, %c0_16] : memref<8x16x16xf32, #tpu.memory_space<vmem>>, vector<1x16x16xf32>
    %14 = vector.shape_cast %13 : vector<1x16x16xf32> to vector<16x16xf32>
    %15 = vector.shape_cast %12 : vector<16x16xf32> to vector<1x16x16xf32>
    tpu.vector_store %arg4[%c1_14, %c0_15, %c0_16], %15 {strides = array<i32>} : memref<8x16x16xf32, #tpu.memory_space<vmem>>, vector<1x16x16xf32>,
    %c2 = arith.constant 2 : index
    %c0_17 = arith.constant 0 : index
    %c0_18 = arith.constant 0 : index
    %16 = vector.load %arg1[%c2, %c0_17, %c0_18] : memref<8x16x16xf32, #tpu.memory_space<vmem>>, vector<1x16x16xf32>
    %17 = vector.shape_cast %16 : vector<1x16x16xf32> to vector<16x16xf32>
    %cst_19 = arith.constant dense<0.000000e+00> : vector<16x16xf32>
    %18 = tpu.matmul %0, %17, %cst_19 {dimension_numbers = #tpu.dot_dimension_numbers<[1], [0], [0], [1], [0, 0, 1, 1], [], []>, precision = #tpu.contract_precision<fp32>} : vector<16x16xf32>, vector<16x16xf32>, vector<16x16xf32> -> vector<16x16xf32>
    %cst_20 = arith.constant dense<0.000000e+00> : vector<16x16xf32>
    %19 = tpu.matmul %18, %1, %cst_20 {dimension_numbers = #tpu.dot_dimension_numbers<[1], [0], [0], [1], [0, 0, 1, 1], [], []>, precision = #tpu.contract_precision<fp32>} : vector<16x16xf32>, vector<16x16xf32>, vector<16x16xf32> -> vector<16x16xf32>
    %c2_21 = arith.constant 2 : index
    %c0_22 = arith.constant 0 : index
    %c0_23 = arith.constant 0 : index
    %20 = vector.load %arg4[%c2_21, %c0_22, %c0_23] : memref<8x16x16xf32, #tpu.memory_space<vmem>>, vector<1x16x16xf32>
    %21 = vector.shape_cast %20 : vector<1x16x16xf32> to vector<16x16xf32>
    %22 = vector.shape_cast %19 : vector<16x16xf32> to vector<1x16x16xf32>
    tpu.vector_store %arg4[%c2_21, %c0_22, %c0_23], %22 {strides = array<i32>} : memref<8x16x16xf32, #tpu.memory_space<vmem>>, vector<1x16x16xf32>,
    %c3 = arith.constant 3 : index
    %c0_24 = arith.constant 0 : index
    %c0_25 = arith.constant 0 : index
    %23 = vector.load %arg1[%c3, %c0_24, %c0_25] : memref<8x16x16xf32, #tpu.memory_space<vmem>>, vector<1x16x16xf32>
    %24 = vector.shape_cast %23 : vector<1x16x16xf32> to vector<16x16xf32>
    %cst_26 = arith.constant dense<0.000000e+00> : vector<16x16xf32>
    %25 = tpu.matmul %0, %24, %cst_26 {dimension_numbers = #tpu.dot_dimension_numbers<[1], [0], [0], [1], [0, 0, 1, 1], [], []>, precision = #tpu.contract_precision<fp32>} : vector<16x16xf32>, vector<16x16xf32>, vector<16x16xf32> -> vector<16x16xf32>
    %cst_27 = arith.constant dense<0.000000e+00> : vector<16x16xf32>
    %26 = tpu.matmul %25, %1, %cst_27 {dimension_numbers = #tpu.dot_dimension_numbers<[1], [0], [0], [1], [0, 0, 1, 1], [], []>, precision = #tpu.contract_precision<fp32>} : vector<16x16xf32>, vector<16x16xf32>, vector<16x16xf32> -> vector<16x16xf32>
    %c3_28 = arith.constant 3 : index
    %c0_29 = arith.constant 0 : index
    %c0_30 = arith.constant 0 : index
    %27 = vector.load %arg4[%c3_28, %c0_29, %c0_30] : memref<8x16x16xf32, #tpu.memory_space<vmem>>, vector<1x16x16xf32>
    %28 = vector.shape_cast %27 : vector<1x16x16xf32> to vector<16x16xf32>
    %29 = vector.shape_cast %26 : vector<16x16xf32> to vector<1x16x16xf32>
    tpu.vector_store %arg4[%c3_28, %c0_29, %c0_30], %29 {strides = array<i32>} : memref<8x16x16xf32, #tpu.memory_space<vmem>>, vector<1x16x16xf32>,
    %c4 = arith.constant 4 : index
    %c0_31 = arith.constant 0 : index
    %c0_32 = arith.constant 0 : index
    %30 = vector.load %arg1[%c4, %c0_31, %c0_32] : memref<8x16x16xf32, #tpu.memory_space<vmem>>, vector<1x16x16xf32>
    %31 = vector.shape_cast %30 : vector<1x16x16xf32> to vector<16x16xf32>
    %cst_33 = arith.constant dense<0.000000e+00> : vector<16x16xf32>
    %32 = tpu.matmul %0, %31, %cst_33 {dimension_numbers = #tpu.dot_dimension_numbers<[1], [0], [0], [1], [0, 0, 1, 1], [], []>, precision = #tpu.contract_precision<fp32>} : vector<16x16xf32>, vector<16x16xf32>, vector<16x16xf32> -> vector<16x16xf32>
    %cst_34 = arith.constant dense<0.000000e+00> : vector<16x16xf32>
    %33 = tpu.matmul %32, %1, %cst_34 {dimension_numbers = #tpu.dot_dimension_numbers<[1], [0], [0], [1], [0, 0, 1, 1], [], []>, precision = #tpu.contract_precision<fp32>} : vector<16x16xf32>, vector<16x16xf32>, vector<16x16xf32> -> vector<16x16xf32>
    %c4_35 = arith.constant 4 : index
    %c0_36 = arith.constant 0 : index
    %c0_37 = arith.constant 0 : index
    %34 = vector.load %arg4[%c4_35, %c0_36, %c0_37] : memref<8x16x16xf32, #tpu.memory_space<vmem>>, vector<1x16x16xf32>
    %35 = vector.shape_cast %34 : vector<1x16x16xf32> to vector<16x16xf32>
    %36 = vector.shape_cast %33 : vector<16x16xf32> to vector<1x16x16xf32>
    tpu.vector_store %arg4[%c4_35, %c0_36, %c0_37], %36 {strides = array<i32>} : memref<8x16x16xf32, #tpu.memory_space<vmem>>, vector<1x16x16xf32>,
    %c5 = arith.constant 5 : index
    %c0_38 = arith.constant 0 : index
    %c0_39 = arith.constant 0 : index
    %37 = vector.load %arg1[%c5, %c0_38, %c0_39] : memref<8x16x16xf32, #tpu.memory_space<vmem>>, vector<1x16x16xf32>
    %38 = vector.shape_cast %37 : vector<1x16x16xf32> to vector<16x16xf32>
    %cst_40 = arith.constant dense<0.000000e+00> : vector<16x16xf32>
    %39 = tpu.matmul %0, %38, %cst_40 {dimension_numbers = #tpu.dot_dimension_numbers<[1], [0], [0], [1], [0, 0, 1, 1], [], []>, precision = #tpu.contract_precision<fp32>} : vector<16x16xf32>, vector<16x16xf32>, vector<16x16xf32> -> vector<16x16xf32>
    %cst_41 = arith.constant dense<0.000000e+00> : vector<16x16xf32>
    %40 = tpu.matmul %39, %1, %cst_41 {dimension_numbers = #tpu.dot_dimension_numbers<[1], [0], [0], [1], [0, 0, 1, 1], [], []>, precision = #tpu.contract_precision<fp32>} : vector<16x16xf32>, vector<16x16xf32>, vector<16x16xf32> -> vector<16x16xf32>
    %c5_42 = arith.constant 5 : index
    %c0_43 = arith.constant 0 : index
    %c0_44 = arith.constant 0 : index
    %41 = vector.load %arg4[%c5_42, %c0_43, %c0_44] : memref<8x16x16xf32, #tpu.memory_space<vmem>>, vector<1x16x16xf32>
    %42 = vector.shape_cast %41 : vector<1x16x16xf32> to vector<16x16xf32>
    %43 = vector.shape_cast %40 : vector<16x16xf32> to vector<1x16x16xf32>
    tpu.vector_store %arg4[%c5_42, %c0_43, %c0_44], %43 {strides = array<i32>} : memref<8x16x16xf32, #tpu.memory_space<vmem>>, vector<1x16x16xf32>,
    %c6 = arith.constant 6 : index
    %c0_45 = arith.constant 0 : index
    %c0_46 = arith.constant 0 : index
    %44 = vector.load %arg1[%c6, %c0_45, %c0_46] : memref<8x16x16xf32, #tpu.memory_space<vmem>>, vector<1x16x16xf32>
    %45 = vector.shape_cast %44 : vector<1x16x16xf32> to vector<16x16xf32>
    %cst_47 = arith.constant dense<0.000000e+00> : vector<16x16xf32>
    %46 = tpu.matmul %0, %45, %cst_47 {dimension_numbers = #tpu.dot_dimension_numbers<[1], [0], [0], [1], [0, 0, 1, 1], [], []>, precision = #tpu.contract_precision<fp32>} : vector<16x16xf32>, vector<16x16xf32>, vector<16x16xf32> -> vector<16x16xf32>
    %cst_48 = arith.constant dense<0.000000e+00> : vector<16x16xf32>
    %47 = tpu.matmul %46, %1, %cst_48 {dimension_numbers = #tpu.dot_dimension_numbers<[1], [0], [0], [1], [0, 0, 1, 1], [], []>, precision = #tpu.contract_precision<fp32>} : vector<16x16xf32>, vector<16x16xf32>, vector<16x16xf32> -> vector<16x16xf32>
    %c6_49 = arith.constant 6 : index
    %c0_50 = arith.constant 0 : index
    %c0_51 = arith.constant 0 : index
    %48 = vector.load %arg4[%c6_49, %c0_50, %c0_51] : memref<8x16x16xf32, #tpu.memory_space<vmem>>, vector<1x16x16xf32>
    %49 = vector.shape_cast %48 : vector<1x16x16xf32> to vector<16x16xf32>
    %50 = vector.shape_cast %47 : vector<16x16xf32> to vector<1x16x16xf32>
    tpu.vector_store %arg4[%c6_49, %c0_50, %c0_51], %50 {strides = array<i32>} : memref<8x16x16xf32, #tpu.memory_space<vmem>>, vector<1x16x16xf32>,
    %c7 = arith.constant 7 : index
    %c0_52 = arith.constant 0 : index
    %c0_53 = arith.constant 0 : index
    %51 = vector.load %arg1[%c7, %c0_52, %c0_53] : memref<8x16x16xf32, #tpu.memory_space<vmem>>, vector<1x16x16xf32>
    %52 = vector.shape_cast %51 : vector<1x16x16xf32> to vector<16x16xf32>
    %cst_54 = arith.constant dense<0.000000e+00> : vector<16x16xf32>
    %53 = tpu.matmul %0, %52, %cst_54 {dimension_numbers = #tpu.dot_dimension_numbers<[1], [0], [0], [1], [0, 0, 1, 1], [], []>, precision = #tpu.contract_precision<fp32>} : vector<16x16xf32>, vector<16x16xf32>, vector<16x16xf32> -> vector<16x16xf32>
    %cst_55 = arith.constant dense<0.000000e+00> : vector<16x16xf32>
    %54 = tpu.matmul %53, %1, %cst_55 {dimension_numbers = #tpu.dot_dimension_numbers<[1], [0], [0], [1], [0, 0, 1, 1], [], []>, precision = #tpu.contract_precision<fp32>} : vector<16x16xf32>, vector<16x16xf32>, vector<16x16xf32> -> vector<16x16xf32>
    %c7_56 = arith.constant 7 : index
    %c0_57 = arith.constant 0 : index
    %c0_58 = arith.constant 0 : index
    %55 = vector.load %arg4[%c7_56, %c0_57, %c0_58] : memref<8x16x16xf32, #tpu.memory_space<vmem>>, vector<1x16x16xf32>
    %56 = vector.shape_cast %55 : vector<1x16x16xf32> to vector<16x16xf32>
    %57 = vector.shape_cast %54 : vector<16x16xf32> to vector<1x16x16xf32>
    tpu.vector_store %arg4[%c7_56, %c0_57, %c0_58], %57 {strides = array<i32>} : memref<8x16x16xf32, #tpu.memory_space<vmem>>, vector<1x16x16xf32>,
    return
  }
  func.func @transform_0(%arg0: i32) -> (i32, i32, i32) {
    %c0_i32 = arith.constant 0 : i32
    %c0_i32_0 = arith.constant 0 : i32
    %c0_i32_1 = arith.constant 0 : i32
    return %arg0, %c0_i32, %c0_i32_0 : i32, i32, i32
  }
  func.func @transform_1(%arg0: i32) -> (i32, i32) {
    %c0_i32 = arith.constant 0 : i32
    %c0_i32_0 = arith.constant 0 : i32
    %c0_i32_1 = arith.constant 0 : i32
    return %c0_i32, %c0_i32_0 : i32, i32
  }
  func.func @transform_2(%arg0: i32) -> (i32, i32) {
    %c0_i32 = arith.constant 0 : i32
    %c0_i32_0 = arith.constant 0 : i32
    %c0_i32_1 = arith.constant 0 : i32
    return %c0_i32, %c0_i32_0 : i32, i32
  }
  func.func @transform_3(%arg0: i32) -> (i32, i32, i32) {
    %c0_i32 = arith.constant 0 : i32
    %c0_i32_0 = arith.constant 0 : i32
    %c0_i32_1 = arith.constant 0 : i32
    return %arg0, %c0_i32, %c0_i32_0 : i32, i32, i32
  }
}

</mosaic_0001>

<bundles_post_ra>
// kernel: tpu_custom_call.1
= control target key start
LH: loop header
LB: loop body
LE: loop exit
PB: predicated region body
PF: predicated region fallthrough
CT: control target
= control target key end

     0   :  { %8 = vsyncpa [#allocation3], 0  ;;  %s10312_s0 = inlined_call_operand.hbm [shape: f32[8,16,16], index: 0, kind: input, shape index: {}]   ;;  %s10313_s1 = inlined_call_operand.hbm [shape: f32[16,16], index: 1, kind: input, shape index: {}]   ;;  %s10314_s2 = inlined_call_operand.hbm [shape: f32[16,16], index: 2, kind: input, shape index: {}]   ;;  %s10315_s3 = inlined_call_operand.hbm [shape: f32[8,16,16], index: 3, kind: output, shape index: {}]  }
   0x1   :  { %9 = vsyncpa [#allocation6], 0 }
   0x2   :  { %10 = vsyncpa [#allocation4], 0  ;;  %s9911_s12 = smov [#allocation5]   ;;  %s9912_s14 = smov [#allocation2]  }
   0x3   :  { %s28_s13 = sshll.u32 %s9911_s12, 4  ;;  %s16_s15 = sshll.u32 %s9912_s14, 4  ;;  %s29_s13 = int_to_ptr.vmem [resolvable:$true] %s28_s13  ;;  %s9937_s15 = int_to_ptr.vmem [resolvable:$true] %s16_s15 }
   0x4   :  { %s9817_s18 = scalar_lea.hbm %s10313_s1, 256 }
   0x5   :  { %p9818_p0 = scmp.ne.s32.totalorder %s10313_s1, %s9817_s18  ;;  %p9821_p1 = scmp.lt.u32.totalorder %s9817_s18, %s10313_s1 }
   0x7   :  { %p9823_p2 = pnand %p9821_p1, %p9818_p0 }
   0x9   :  { %9826 = shalt.err (!%p9823_p2)
}
   0xa   :  { %s9827_s23 = scalar_lea.vmem %s29_s13, 256  ;;  %p9832_p4 = scmp.lt.s32.totalorder %s29_s13, %s29_s13 }
   0xb   :  { %p9828_p3 = scmp.ne.s32.totalorder %s29_s13, %s9827_s23  ;;  %p9833_p5 = scmp.lt.s32.totalorder %s9827_s23, %s9827_s23 }
   0xd   :  { %p9834_p6 = por %p9833_p5, %p9832_p4 }
   0xf   :  { %p9835_p7 = pnand %p9834_p6, %p9828_p3 }
  0x11   :  { %9838 = shalt.err (!%p9835_p7)
}
  0x12   :  { %s9913_s24 = smov 128   ;;  %s9914_s25 = smov 8  }
  0x13   :  { %34 = dma.hbm_to_vmem [thread:$0]  %s10313_s1, 256, %s29_s13, [#allocation6], %s9913_s24, %s9913_s24, %s9914_s25  }
  0x14   :  { %s9839_s30 = scalar_lea.hbm %s10312_s0, 2048 }
  0x15   :  { %p9840_p8 = scmp.ne.s32.totalorder %s10312_s0, %s9839_s30  ;;  %p9843_p9 = scmp.lt.u32.totalorder %s9839_s30, %s10312_s0 }
  0x17   :  { %p9845_p10 = pnand %p9843_p9, %p9840_p8 }
  0x19   :  { %9848 = shalt.err (!%p9845_p10)
}
  0x1a   :  { %s9849_s8 = scalar_lea.vmem %s9937_s15, 2048  ;;  %p9854_p12 = scmp.lt.s32.totalorder %s9937_s15, %s9937_s15 }
  0x1b   :  { %p9850_p11 = scmp.ne.s32.totalorder %s9937_s15, %s9849_s8  ;;  %p9855_p13 = scmp.lt.s32.totalorder %s9849_s8, %s9849_s8 }
  0x1d   :  { %p9856_p0 = por %p9855_p13, %p9854_p12 }
  0x1f   :  { %p9857_p1 = pnand %p9856_p0, %p9850_p11 }
  0x21   :  { %9860 = shalt.err (!%p9857_p1)
}
  0x22   :  { %22 = dma.hbm_to_vmem [thread:$0]  %s10312_s0, 2048, %s9937_s15, [#allocation3], %s9913_s24, %s9913_s24, %s9914_s25  }
  0x23   :  { %s9915_s10 = smov [#allocation7]   ;;  %s9861_s14 = scalar_lea.hbm %s10314_s2, 256 }
  0x24   :  { %s40_s11 = sshll.u32 %s9915_s10, 4  ;;  %p9862_p2 = scmp.ne.s32.totalorder %s10314_s2, %s9861_s14  ;;  %s41_s11 = int_to_ptr.vmem [resolvable:$true] %s40_s11 }
  0x25   :  { %p9865_p3 = scmp.lt.u32.totalorder %s9861_s14, %s10314_s2 }
  0x27   :  { %p9867_p4 = pnand %p9865_p3, %p9862_p2 }
  0x29   :  { %9870 = shalt.err (!%p9867_p4)
}
  0x2a   :  { %s9871_s20 = scalar_lea.vmem %s41_s11, 256  ;;  %p9876_p6 = scmp.lt.s32.totalorder %s41_s11, %s41_s11 }
  0x2b   :  { %p9872_p5 = scmp.ne.s32.totalorder %s41_s11, %s9871_s20  ;;  %p9877_p7 = scmp.lt.s32.totalorder %s9871_s20, %s9871_s20 }
  0x2d   :  { %p9878_p8 = por %p9877_p7, %p9876_p6 }
  0x2f   :  { %p9879_p9 = pnand %p9878_p8, %p9872_p5 }
  0x31   :  { %9882 = shalt.err (!%p9879_p9)
}
  0x32   :  { %46 = dma.hbm_to_vmem [thread:$0]  %s10314_s2, 256, %s41_s11, [#allocation6], %s9913_s24, %s9913_s24, %s9914_s25  }
  0x33   :  { %9905 = dma.done.wait [#allocation3], 2048  }
  0x34   :  { %9906 = vsyncadd [#allocation3], 4294965248 }
  0x35   :  { %9907 = dma.done.wait [#allocation6], 512  }
  0x36   :  { %9908 = vsyncadd [#allocation6], 4294966784  ;;  %vm62_vm0 = vcmask 130048   ;;  %v60_v0 = vld [vmem:[#allocation2] sm:$0xff]  ;;  %v61_v1 = vld [vmem:[#allocation2 + $0x8] sm:$0xff]  ;;  %s9916_s2 = smov [#allocation8]  }
  0x37   :  { %v56_v2 = vld [vmem:[#allocation5] sm:$0xff]  ;;  %v70_v3 = vand.u32 4294901760, %v60_v0  ;;  %v73_v4 = vand.u32 4294901760, %v61_v1  ;;  %v57_v6 = vld [vmem:[#allocation5 + $0x8] sm:$0xff]  ;;  %v1082_v30 = vld [vmem:[#allocation2 + $0x10] sm:$0xff]  ;;  %s8198_s21 = sshll.u32 %s9916_s2, 4  ;;  %s8199_s21 = int_to_ptr.vmem [resolvable:$true] %s8198_s21 }
  0x38   :  { %v64_v5 = vsel %vm62_vm0, %v56_v2, 0  ;;  %v67_v8 = vsel %vm62_vm0, %v57_v6, 0  ;;  %v1083_v31 = vld [vmem:[#allocation2 + $0x18] sm:$0xff]  ;;  %v1085_v32 = vand.u32 4294901760, %v1082_v30  ;;  %v2098_v46 = vld [vmem:[#allocation2 + $0x20] sm:$0xff]  ;;  %v2099_v47 = vld [vmem:[#allocation2 + $0x28] sm:$0xff]  ;;  %p9888_p11 = scmp.lt.s32.totalorder %s8199_s21, %s8199_s21 }
  0x39   :  { %v9990_v7 = vand.u32 4294901760, %v64_v5  ;;  %v9267_v9 = vpack.c.bf16 %v73_v4, %v70_v3  ;;  %v9993_v10 = vand.u32 4294901760, %v67_v8  ;;  %v158_v11 = vsub.f32 %v60_v0, %v70_v3  ;;  %v3114_v62 = vld [vmem:[#allocation2 + $0x30] sm:$0xff]  ;;  %v3115_v63 = vld [vmem:[#allocation2 + $0x38] sm:$0xff]  ;;  %s9883_s22 = scalar_lea.vmem %s8199_s21, 2048 }
  0x3a   :  { %v165_v12 = vsub.f32 %v61_v1, %v73_v4  ;;  %v1088_v33 = vand.u32 4294901760, %v1083_v31  ;;  %v1173_v34 = vsub.f32 %v1082_v30, %v1085_v32  ;;  %v2101_v48 = vand.u32 4294901760, %v2098_v46  ;;  %p9884_p10 = scmp.ne.s32.totalorder %s8199_s21, %s9883_s22  ;;  %p9889_p12 = scmp.lt.s32.totalorder %s9883_s22, %s9883_s22 }
  0x3b   :  { %v9996_v13 = vsub.f32 %v64_v5, %v9990_v7  ;;  %9268 = vmatprep.subr.bf16.mxu0 %v9267_v9  ;;  %v9999_v14 = vsub.f32 %v67_v8, %v9993_v10  ;;  %v159_v15 = vand.u32 4294901760, %v158_v11  ;;  %v2104_v49 = vand.u32 4294901760, %v2099_v47 }
  0x3c   :  { %v166_v16 = vand.u32 4294901760, %v165_v12  ;;  %9270 = vmatpush3.bf16.msra.mxu0 %v9267_v9  ;;  %v9275_v28 = vpack.c.bf16 %v165_v12, %v158_v11  ;;  %v1180_v35 = vsub.f32 %v1083_v31, %v1088_v33  ;;  %v1174_v36 = vand.u32 4294901760, %v1173_v34  ;;  %p9890_p13 = por %p9889_p12, %p9888_p11 }
  0x3d   :  { %v10002_v17 = vand.u32 4294901760, %v9996_v13  ;;  %v10005_v18 = vand.u32 4294901760, %v9999_v14  ;;  %v160_v19 = vsub.f32 %v158_v11, %v159_v15  ;;  %v9315_v38 = vpack.c.bf16 %v1088_v33, %v1085_v32 }
  0x3e   :  { %v167_v20 = vsub.f32 %v165_v12, %v166_v16  ;;  %v9283_v29 = vpack.c.bf16 %v166_v16, %v159_v15  ;;  %v1181_v37 = vand.u32 4294901760, %v1180_v35  ;;  %v1175_v39 = vsub.f32 %v1173_v34, %v1174_v36  ;;  %v58_v16 = vld [vmem:[#allocation7] sm:$0xff]  ;;  %p9891_p0 = pnand %p9890_p13, %p9884_p10 }
  0x3f   :  { %v139_v21 = vsub.f32 %v9996_v13, %v10002_v17  ;;  %v149_v22 = vsub.f32 %v9999_v14, %v10005_v18  ;;  %v161_v23 = vand.u32 4294901760, %v160_v19  ;;  %v9323_v44 = vpack.c.bf16 %v1180_v35, %v1173_v34  ;;  %v59_v19 = vld [vmem:[#allocation7 + $0x8] sm:$0xff] }
  0x40   :  { %v168_v24 = vand.u32 4294901760, %v167_v20  ;;  %v1182_v40 = vsub.f32 %v1180_v35, %v1181_v37  ;;  %v1176_v41 = vand.u32 4294901760, %v1175_v39  ;;  %v9331_v45 = vpack.c.bf16 %v1181_v37, %v1174_v36  ;;  %v4130_v37 = vld [vmem:[#allocation2 + $0x40] sm:$0xff] }
  0x41   :  { %v10011_v25 = vand.u32 4294901760, %v139_v21  ;;  %v10013_v26 = vand.u32 4294901760, %v149_v22  ;;  %v2189_v50 = vsub.f32 %v2098_v46, %v2101_v48  ;;  %v2196_v51 = vsub.f32 %v2099_v47, %v2104_v49 }
  0x42   :  { %v9271_v27 = vpack.c.bf16 %v168_v24, %v161_v23  ;;  %v1183_v42 = vand.u32 4294901760, %v1182_v40  ;;  %v9363_v54 = vpack.c.bf16 %v2104_v49, %v2101_v48  ;;  %v3117_v0 = vand.u32 4294901760, %v3114_v62 }
  0x43   :  { %8599 = vmatprep.mubr.f32.mxu0 %v10011_v25  ;;  %v2190_v52 = vand.u32 4294901760, %v2189_v50  ;;  %v2197_v53 = vand.u32 4294901760, %v2196_v51  ;;  %v9371_v60 = vpack.c.bf16 %v2196_v51, %v2189_v50  ;;  %v3120_v1 = vand.u32 4294901760, %v3115_v63 }
  0x44   :  { %8600 = vmatmul.mubr.f32.vlgmr.msra.gmra.mrb[0].mxu0 %v10013_v26  ;;  %9272 = vmatprep.subr.bf16.mxu0 %v9271_v27  ;;  %v9319_v43 = vpack.c.bf16 %v1183_v42, %v1176_v41  ;;  %v3205_v2 = vsub.f32 %v3114_v62, %v3117_v0  ;;  %v578_v20 = vand.u32 4294901760, %v58_v16  ;;  %v581_v21 = vand.u32 4294901760, %v59_v19 }
  0x45   :  { %9274 = vmatpush3.bf16.msra.mxu0 %v9271_v27  ;;  %8606 = vmatprep.mubr.f32.mxu0 %v9990_v7  ;;  %v2191_v55 = vsub.f32 %v2189_v50, %v2190_v52  ;;  %v2198_v56 = vsub.f32 %v2196_v51, %v2197_v53  ;;  %v9379_v61 = vpack.c.bf16 %v2197_v53, %v2190_v52  ;;  %v4133_v39 = vand.u32 4294901760, %v4130_v37 }
  0x46   :  { %9276 = vmatprep.subr.bf16.mxu0 %v9275_v28  ;;  %v3212_v3 = vsub.f32 %v3115_v63, %v3120_v1  ;;  %v3206_v4 = vand.u32 4294901760, %v3205_v2  ;;  %v9411_v6 = vpack.c.bf16 %v3120_v1, %v3117_v0  ;;  %v10052_v23 = vpack.c.bf16 %v581_v21, %v578_v20 }
  0x47   :  { %v2192_v57 = vand.u32 4294901760, %v2191_v55  ;;  %v2199_v58 = vand.u32 4294901760, %v2198_v56  ;;  %v666_v24 = vsub.f32 %v58_v16, %v578_v20  ;;  %v673_v27 = vsub.f32 %v59_v19, %v581_v21  ;;  %v5147_v55 = vld [vmem:[#allocation2 + $0x58] sm:$0xff] }
  0x48   :  { %v3213_v5 = vand.u32 4294901760, %v3212_v3  ;;  %v3207_v8 = vsub.f32 %v3205_v2, %v3206_v4  ;;  %v9419_v22 = vpack.c.bf16 %v3212_v3, %v3205_v2  ;;  %9292 = vmatprep.subr.bf16.mxu1 %v10052_v23  ;;  %v4221_v41 = vsub.f32 %v4130_v37, %v4133_v39 }
  0x49   :  { %v9367_v59 = vpack.c.bf16 %v2199_v58, %v2192_v57  ;;  %9294 = vmatpush3.bf16.msra.mxu1 %v10052_v23  ;;  %v10063_v35 = vpack.c.bf16 %v673_v27, %v666_v24  ;;  %v5152_v57 = vand.u32 4294901760, %v5147_v55 }
  0x4a   :  { %v3208_v11 = vand.u32 4294901760, %v3207_v8  ;;  %v9427_v36 = vpack.c.bf16 %v3213_v5, %v3206_v4  ;;  %v6163_v8 = vld [vmem:[#allocation2 + $0x68] sm:$0xff] }
  0x4c   :  { %8607 = vmatmul.mubr.f32.vlgmr.msra.gmra.mrb[0].mxu0 %v9993_v10 }
  0x4d   :  { %9278 = vmatpush3.bf16.msra.mxu0 %v9275_v28  ;;  %8613 = vmatprep.mubr.f32.mxu0 %v9996_v13  ;;  %v667_v28 = vand.u32 4294901760, %v666_v24 }
  0x4e   :  { %9280 = vmatprep.subr.bf16.mxu0 %v9267_v9 }
  0x4f   :  { %v668_v30 = vsub.f32 %v666_v24, %v667_v28 }
  0x51   :  { %v669_v32 = vand.u32 4294901760, %v668_v30 }
  0x54   :  { %8614 = vmatmul.mubr.f32.vlgmr.msra.gmra.mrb[0].mxu0 %v9999_v14 }
  0x55   :  { %9282 = vmatpush3.bf16.msra.mxu0 %v9267_v9  ;;  %8620 = vmatprep.mubr.f32.mxu0 %v10002_v17 }
  0x56   :  { %9284 = vmatprep.subr.bf16.mxu0 %v9283_v29 }
  0x5c   :  { %8621 = vmatmul.mubr.f32.vlgmr.msra.gmra.mrb[0].mxu0 %v10005_v18 }
  0x5d   :  { %9286 = vmatpush3.bf16.msra.mxu0 %v9283_v29  ;;  %8627 = vmatprep.mubr.f32.mxu0 %v9990_v7  ;;  %v674_v29 = vand.u32 4294901760, %v673_v27 }
  0x5e   :  { %9288 = vmatprep.subr.bf16.mxu0 %v9267_v9 }
  0x5f   :  { %v675_v31 = vsub.f32 %v673_v27, %v674_v29 }
  0x61   :  { %v676_v33 = vand.u32 4294901760, %v675_v31 }
  0x63   :  { %v10058_v34 = vpack.c.bf16 %v676_v33, %v669_v32 }
  0x64   :  { %8628 = vmatmul.mubr.f32.vlgmr.msra.gmra.mrb[0].mxu0 %v9993_v10 }
  0x65   :  { %9290 = vmatpush3.bf16.msra.mxu0 %v9267_v9  ;;  %8634 = vmatprep.mubr.f32.mxu0 %v9990_v7  ;;  %v3214_v9 = vsub.f32 %v3212_v3, %v3213_v5 }
  0x66   :  { %9316 = vmatprep.subr.bf16.mxu0 %v9315_v38  ;;  %9296 = vmatprep.subr.bf16.mxu1 %v10058_v34 }
  0x67   :  { %v3215_v12 = vand.u32 4294901760, %v3214_v9 }
  0x69   :  { %v9415_v15 = vpack.c.bf16 %v3215_v12, %v3208_v11  ;;  %v6168_v11 = vand.u32 4294901760, %v6163_v8 }
  0x6c   :  { %8635 = vmatmul.mubr.f32.vlgmr.msra.gmra.mrb[0].mxu0 %v9993_v10 }
  0x6d   :  { %9318 = vmatpush3.bf16.msra.mxu0 %v9315_v38  ;;  %8683 = vmatprep.mubr.f32.mxu0 %v10011_v25 }
  0x6e   :  { %9320 = vmatprep.subr.bf16.mxu0 %v9319_v43 }
  0x70   :  { %8684 = vmatmul.mubr.f32.vlgmr.msra.gmra.mrb[2].mxu0 %v10013_v26 }
  0x71   :  { %9322 = vmatpush3.bf16.msra.mxu0 %v9319_v43  ;;  %8690 = vmatprep.mubr.f32.mxu0 %v9990_v7  ;;  %v4222_v43 = vand.u32 4294901760, %v4221_v41 }
  0x72   :  { %9324 = vmatprep.subr.bf16.mxu0 %v9323_v44 }
  0x73   :  { %v4223_v47 = vsub.f32 %v4221_v41, %v4222_v43 }
  0x75   :  { %v4224_v49 = vand.u32 4294901760, %v4223_v47 }
  0x78   :  { %8691 = vmatmul.mubr.f32.vlgmr.msra.gmra.mrb[2].mxu0 %v9993_v10 }
  0x79   :  { %9326 = vmatpush3.bf16.msra.mxu0 %v9323_v44  ;;  %8697 = vmatprep.mubr.f32.mxu0 %v9996_v13 }
  0x7a   :  { %9328 = vmatprep.subr.bf16.mxu0 %v9315_v38 }
  0x80   :  { %8698 = vmatmul.mubr.f32.vlgmr.msra.gmra.mrb[2].mxu0 %v9999_v14 }
  0x81   :  { %9330 = vmatpush3.bf16.msra.mxu0 %v9315_v38  ;;  %8704 = vmatprep.mubr.f32.mxu0 %v10002_v17 }
  0x82   :  { %9332 = vmatprep.subr.bf16.mxu0 %v9331_v45 }
  0x88   :  { %8705 = vmatmul.mubr.f32.vlgmr.msra.gmra.mrb[2].mxu0 %v10005_v18 }
  0x89   :  { %9334 = vmatpush3.bf16.msra.mxu0 %v9331_v45  ;;  %8711 = vmatprep.mubr.f32.mxu0 %v9990_v7  ;;  %v10069_v45 = vpack.c.bf16 %v674_v29, %v667_v28 }
  0x8a   :  { %9336 = vmatprep.subr.bf16.mxu0 %v9315_v38 }
  0x90   :  { %8712 = vmatmul.mubr.f32.vlgmr.msra.gmra.mrb[2].mxu0 %v9993_v10 }
  0x91   :  { %9338 = vmatpush3.bf16.msra.mxu0 %v9315_v38  ;;  %8718 = vmatprep.mubr.f32.mxu0 %v9990_v7  ;;  %v4131_v38 = vld [vmem:[#allocation2 + $0x48] sm:$0xff] }
  0x92   :  { %9364 = vmatprep.subr.bf16.mxu0 %v9363_v54  ;;  %v4136_v40 = vand.u32 4294901760, %v4131_v38 }
  0x94   :  { %v4228_v42 = vsub.f32 %v4131_v38, %v4136_v40  ;;  %v9459_v46 = vpack.c.bf16 %v4136_v40, %v4133_v39 }
  0x96   :  { %v4229_v44 = vand.u32 4294901760, %v4228_v42  ;;  %v9467_v52 = vpack.c.bf16 %v4228_v42, %v4221_v41 }
  0x98   :  { %8719 = vmatmul.mubr.f32.vlgmr.msra.gmra.mrb[2].mxu0 %v9993_v10  ;;  %v4230_v48 = vsub.f32 %v4228_v42, %v4229_v44  ;;  %v9475_v53 = vpack.c.bf16 %v4229_v44, %v4222_v43 }
  0x99   :  { %9366 = vmatpush3.bf16.msra.mxu0 %v9363_v54  ;;  %8767 = vmatprep.mubr.f32.mxu0 %v10011_v25 }
  0x9a   :  { %9368 = vmatprep.subr.bf16.mxu0 %v9367_v59  ;;  %v4231_v50 = vand.u32 4294901760, %v4230_v48  ;;  %v7178_v48 = vld [vmem:[#allocation2 + $0x70] sm:$0xff] }
  0x9c   :  { %8768 = vmatmul.mubr.f32.vlgmr.msra.gmra.mrb[4].mxu0 %v10013_v26  ;;  %v9463_v51 = vpack.c.bf16 %v4231_v50, %v4224_v49  ;;  %v7179_v49 = vld [vmem:[#allocation2 + $0x78] sm:$0xff]  ;;  %v7181_v50 = vand.u32 4294901760, %v7178_v48 }
  0x9d   :  { %9370 = vmatpush3.bf16.msra.mxu0 %v9367_v59  ;;  %8774 = vmatprep.mubr.f32.mxu0 %v9990_v7  ;;  %v5244_v59 = vsub.f32 %v5147_v55, %v5152_v57 }
  0x9e   :  { %9372 = vmatprep.subr.bf16.mxu0 %v9371_v60 }
  0xa4   :  { %8775 = vmatmul.mubr.f32.vlgmr.msra.gmra.mrb[4].mxu0 %v9993_v10 }
  0xa5   :  { %9374 = vmatpush3.bf16.msra.mxu0 %v9371_v60  ;;  %8781 = vmatprep.mubr.f32.mxu0 %v9996_v13 }
  0xa6   :  { %9376 = vmatprep.subr.bf16.mxu0 %v9363_v54 }
  0xac   :  { %8782 = vmatmul.mubr.f32.vlgmr.msra.gmra.mrb[4].mxu0 %v9999_v14 }
  0xad   :  { %9378 = vmatpush3.bf16.msra.mxu0 %v9363_v54  ;;  %8788 = vmatprep.mubr.f32.mxu0 %v10002_v17 }
  0xae   :  { %9380 = vmatprep.subr.bf16.mxu0 %v9379_v61 }
  0xb4   :  { %8789 = vmatmul.mubr.f32.vlgmr.msra.gmra.mrb[4].mxu0 %v10005_v18 }
  0xb5   :  { %9382 = vmatpush3.bf16.msra.mxu0 %v9379_v61  ;;  %8795 = vmatprep.mubr.f32.mxu0 %v9990_v7  ;;  %v5245_v61 = vand.u32 4294901760, %v5244_v59 }
  0xb6   :  { %9384 = vmatprep.subr.bf16.mxu0 %v9363_v54 }
  0xb7   :  { %v5246_v0 = vsub.f32 %v5244_v59, %v5245_v61 }
  0xb9   :  { %v5247_v2 = vand.u32 4294901760, %v5246_v0 }
  0xbc   :  { %8796 = vmatmul.mubr.f32.vlgmr.msra.gmra.mrb[4].mxu0 %v9993_v10 }
  0xbd   :  { %9386 = vmatpush3.bf16.msra.mxu0 %v9363_v54  ;;  %8802 = vmatprep.mubr.f32.mxu0 %v9990_v7  ;;  %v5146_v54 = vld [vmem:[#allocation2 + $0x50] sm:$0xff] }
  0xbe   :  { %9412 = vmatprep.subr.bf16.mxu0 %v9411_v6  ;;  %v5149_v56 = vand.u32 4294901760, %v5146_v54 }
  0xc0   :  { %v5237_v58 = vsub.f32 %v5146_v54, %v5149_v56  ;;  %v9507_v62 = vpack.c.bf16 %v5152_v57, %v5149_v56 }
  0xc2   :  { %v5238_v60 = vand.u32 4294901760, %v5237_v58  ;;  %v9515_v4 = vpack.c.bf16 %v5244_v59, %v5237_v58 }
  0xc4   :  { %8803 = vmatmul.mubr.f32.vlgmr.msra.gmra.mrb[4].mxu0 %v9993_v10  ;;  %v5239_v63 = vsub.f32 %v5237_v58, %v5238_v60  ;;  %v9523_v5 = vpack.c.bf16 %v5245_v61, %v5238_v60 }
  0xc5   :  { %9414 = vmatpush3.bf16.msra.mxu0 %v9411_v6  ;;  %8851 = vmatprep.mubr.f32.mxu0 %v10011_v25 }
  0xc6   :  { %9416 = vmatprep.subr.bf16.mxu0 %v9415_v15  ;;  %v5240_v1 = vand.u32 4294901760, %v5239_v63 }
  0xc8   :  { %8852 = vmatmul.mubr.f32.vlgmr.msra.gmra.mrb[6].mxu0 %v10013_v26  ;;  %v9511_v3 = vpack.c.bf16 %v5247_v2, %v5240_v1 }
  0xc9   :  { %9418 = vmatpush3.bf16.msra.mxu0 %v9415_v15  ;;  %8858 = vmatprep.mubr.f32.mxu0 %v9990_v7  ;;  %v6260_v15 = vsub.f32 %v6163_v8, %v6168_v11 }
  0xca   :  { %9420 = vmatprep.subr.bf16.mxu0 %v9419_v22 }
  0xcb   :  { %v6261_v19 = vand.u32 4294901760, %v6260_v15 }
  0xd0   :  { %8859 = vmatmul.mubr.f32.vlgmr.msra.gmra.mrb[6].mxu0 %v9993_v10 }
  0xd1   :  { %9422 = vmatpush3.bf16.msra.mxu0 %v9419_v22  ;;  %8865 = vmatprep.mubr.f32.mxu0 %v9996_v13  ;;  %v6262_v22 = vsub.f32 %v6260_v15, %v6261_v19 }
  0xd2   :  { %9424 = vmatprep.subr.bf16.mxu0 %v9411_v6 }
  0xd3   :  { %v6263_v33 = vand.u32 4294901760, %v6262_v22 }
  0xd8   :  { %8866 = vmatmul.mubr.f32.vlgmr.msra.gmra.mrb[6].mxu0 %v9999_v14 }
  0xd9   :  { %9426 = vmatpush3.bf16.msra.mxu0 %v9411_v6  ;;  %8872 = vmatprep.mubr.f32.mxu0 %v10002_v17 }
  0xda   :  { %9428 = vmatprep.subr.bf16.mxu0 %v9427_v36 }
  0xe0   :  { %8873 = vmatmul.mubr.f32.vlgmr.msra.gmra.mrb[6].mxu0 %v10005_v18 }
  0xe1   :  { %9430 = vmatpush3.bf16.msra.mxu0 %v9427_v36  ;;  %8879 = vmatprep.mubr.f32.mxu0 %v9990_v7 }
  0xe2   :  { %9432 = vmatprep.subr.bf16.mxu0 %v9411_v6 }
  0xe8   :  { %8880 = vmatmul.mubr.f32.vlgmr.msra.gmra.mrb[6].mxu0 %v9993_v10 }
  0xe9   :  { %9434 = vmatpush3.bf16.msra.mxu0 %v9411_v6  ;;  %8886 = vmatprep.mubr.f32.mxu0 %v9990_v7  ;;  %v6162_v6 = vld [vmem:[#allocation2 + $0x60] sm:$0xff] }
  0xea   :  { %9460 = vmatprep.subr.bf16.mxu0 %v9459_v46  ;;  %v6165_v9 = vand.u32 4294901760, %v6162_v6 }
  0xec   :  { %v6253_v12 = vsub.f32 %v6162_v6, %v6165_v9  ;;  %v10095_v20 = vpack.c.bf16 %v6168_v11, %v6165_v9 }
  0xee   :  { %v6254_v16 = vand.u32 4294901760, %v6253_v12 }
  0xf0   :  { %8887 = vmatmul.mubr.f32.vlgmr.msra.gmra.mrb[6].mxu0 %v9993_v10  ;;  %v6255_v21 = vsub.f32 %v6253_v12, %v6254_v16  ;;  %v9571_v47 = vpack.c.bf16 %v6261_v19, %v6254_v16 }
  0xf1   :  { %9462 = vmatpush3.bf16.msra.mxu0 %v9459_v46  ;;  %8935 = vmatprep.mubr.f32.mxu0 %v10011_v25 }
  0xf2   :  { %9464 = vmatprep.subr.bf16.mxu0 %v9463_v51  ;;  %v6256_v32 = vand.u32 4294901760, %v6255_v21 }
  0xf4   :  { %8936 = vmatmul.mubr.f32.vlgmr.msra.gmra.mrb[8].mxu0 %v10013_v26  ;;  %v9559_v40 = vpack.c.bf16 %v6263_v33, %v6256_v32 }
  0xf5   :  { %9466 = vmatpush3.bf16.msra.mxu0 %v9463_v51  ;;  %8942 = vmatprep.mubr.f32.mxu0 %v9990_v7  ;;  %v7184_v51 = vand.u32 4294901760, %v7179_v49 }
  0xf6   :  { %9468 = vmatprep.subr.bf16.mxu0 %v9467_v52 }
  0xf7   :  { %v10139_v57 = vpack.c.bf16 %v7184_v51, %v7181_v50 }
  0xfc   :  { %8943 = vmatmul.mubr.f32.vlgmr.msra.gmra.mrb[8].mxu0 %v9993_v10 }
  0xfd   :  { %9470 = vmatpush3.bf16.msra.mxu0 %v9467_v52  ;;  %8949 = vmatprep.mubr.f32.mxu0 %v9996_v13  ;;  %v10127_v52 = vsub.f32 %v7178_v48, %v7181_v50 }
  0xfe   :  { %9472 = vmatprep.subr.bf16.mxu0 %v9459_v46 }
  0xff   :  { %v7270_v54 = vand.u32 4294901760, %v10127_v52 }
 0x101   :  { %v7271_v58 = vsub.f32 %v10127_v52, %v7270_v54 }
 0x103   :  { %v7272_v2 = vand.u32 4294901760, %v7271_v58 }
 0x104   :  { %8950 = vmatmul.mubr.f32.vlgmr.msra.gmra.mrb[8].mxu0 %v9999_v14 }
 0x105   :  { %9474 = vmatpush3.bf16.msra.mxu0 %v9459_v46  ;;  %8956 = vmatprep.mubr.f32.mxu0 %v10002_v17 }
 0x106   :  { %9476 = vmatprep.subr.bf16.mxu0 %v9475_v53 }
 0x10c   :  { %8957 = vmatmul.mubr.f32.vlgmr.msra.gmra.mrb[8].mxu0 %v10005_v18 }
 0x10d   :  { %9478 = vmatpush3.bf16.msra.mxu0 %v9475_v53  ;;  %8963 = vmatprep.mubr.f32.mxu0 %v9990_v7  ;;  %v10129_v53 = vsub.f32 %v7179_v49, %v7184_v51 }
 0x10e   :  { %9480 = vmatprep.subr.bf16.mxu0 %v9459_v46 }
 0x10f   :  { %v7277_v55 = vand.u32 4294901760, %v10129_v53  ;;  %v9611_v16 = vpack.c.bf16 %v10129_v53, %v10127_v52 }
 0x111   :  { %v7278_v59 = vsub.f32 %v10129_v53, %v7277_v55 }
 0x114   :  { %8964 = vmatmul.mubr.f32.vlgmr.msra.gmra.mrb[8].mxu0 %v9993_v10 }
 0x115   :  { %9482 = vmatpush3.bf16.msra.mxu0 %v9459_v46  ;;  %8970 = vmatprep.mubr.f32.mxu0 %v9990_v7  ;;  %v9563_v46 = vpack.c.bf16 %v6260_v15, %v6253_v12 }
 0x116   :  { %9508 = vmatprep.subr.bf16.mxu0 %v9507_v62 }
 0x11c   :  { %8971 = vmatmul.mubr.f32.vlgmr.msra.gmra.mrb[8].mxu0 %v9993_v10 }
 0x11d   :  { %9510 = vmatpush3.bf16.msra.mxu0 %v9507_v62  ;;  %9019 = vmatprep.mubr.f32.mxu0 %v10011_v25 }
 0x11e   :  { %9512 = vmatprep.subr.bf16.mxu0 %v9511_v3 }
 0x120   :  { %9020 = vmatmul.mubr.f32.vlgmr.msra.gmra.mrb[10].mxu0 %v10013_v26 }
 0x121   :  { %9514 = vmatpush3.bf16.msra.mxu0 %v9511_v3  ;;  %9026 = vmatprep.mubr.f32.mxu0 %v9990_v7  ;;  %v7279_v3 = vand.u32 4294901760, %v7278_v59 }
 0x122   :  { %9516 = vmatprep.subr.bf16.mxu0 %v9515_v4 }
 0x123   :  { %v9607_v9 = vpack.c.bf16 %v7279_v3, %v7272_v2 }
 0x128   :  { %9027 = vmatmul.mubr.f32.vlgmr.msra.gmra.mrb[10].mxu0 %v9993_v10 }
 0x129   :  { %9518 = vmatpush3.bf16.msra.mxu0 %v9515_v4  ;;  %9033 = vmatprep.mubr.f32.mxu0 %v9996_v13 }
 0x12a   :  { %9520 = vmatprep.subr.bf16.mxu0 %v9507_v62 }
 0x130   :  { %9034 = vmatmul.mubr.f32.vlgmr.msra.gmra.mrb[10].mxu0 %v9999_v14 }
 0x131   :  { %9522 = vmatpush3.bf16.msra.mxu0 %v9507_v62  ;;  %9040 = vmatprep.mubr.f32.mxu0 %v10002_v17 }
 0x132   :  { %9524 = vmatprep.subr.bf16.mxu0 %v9523_v5 }
 0x138   :  { %9041 = vmatmul.mubr.f32.vlgmr.msra.gmra.mrb[10].mxu0 %v10005_v18 }
 0x139   :  { %9526 = vmatpush3.bf16.msra.mxu0 %v9523_v5  ;;  %9047 = vmatprep.mubr.f32.mxu0 %v9990_v7 }
 0x13a   :  { %9528 = vmatprep.subr.bf16.mxu0 %v9507_v62 }
 0x13f   :  { %v8636_v24 = vpop.f32.mrb[0].mxu0 }
 0x140   :  { %v575_v27 = vsel %vm62_vm0, %v8636_v24, 0  ;;  %v561_v28 = vpop.f32.mrb[1].mxu0  ;;  %9048 = vmatmul.mubr.f32.vlgmr.msra.gmra.mrb[10].mxu0 %v9993_v10 }
 0x141   :  { %v10099_v29 = vand.u32 4294901760, %v575_v27  ;;  %v572_v30 = vsel %vm62_vm0, %v561_v28, 0  ;;  %9530 = vmatpush3.bf16.msra.mxu0 %v9507_v62  ;;  %9054 = vmatprep.mubr.f32.mxu0 %v9990_v7 }
 0x142   :  { %v10103_v31 = vand.u32 4294901760, %v572_v30  ;;  %9556 = vmatprep.subr.bf16.mxu0 %v10095_v20 }
 0x143   :  { %v655_v36 = vsub.f32 %v575_v27, %v10099_v29 }
 0x144   :  { %v645_v37 = vsub.f32 %v572_v30, %v10103_v31 }
 0x145   :  { %v656_v38 = vand.u32 4294901760, %v655_v36 }
 0x146   :  { %v646_v39 = vand.u32 4294901760, %v645_v37 }
 0x147   :  { %v657_v41 = vsub.f32 %v655_v36, %v656_v38 }
 0x148   :  { %9055 = vmatmul.mubr.f32.vlgmr.msra.gmra.mrb[10].mxu0 %v9993_v10  ;;  %v647_v42 = vsub.f32 %v645_v37, %v646_v39 }
 0x149   :  { %9558 = vmatpush3.bf16.msra.mxu0 %v10095_v20  ;;  %9103 = vmatprep.mubr.f32.mxu0 %v10011_v25  ;;  %v658_v44 = vand.u32 4294901760, %v657_v41 }
 0x14a   :  { %v648_v43 = vand.u32 4294901760, %v647_v42  ;;  %9560 = vmatprep.subr.bf16.mxu0 %v9559_v40 }
 0x14c   :  { %8641 = vmatprep.mubr.f32.mxu1 %v648_v43  ;;  %9104 = vmatmul.mubr.f32.vlgmr.msra.gmra.mrb[12].mxu0 %v10013_v26 }
 0x14d   :  { %8642 = vmatmul.mubr.f32.vlgmr.msra.gmra.mrb[0].mxu1 %v658_v44  ;;  %9562 = vmatpush3.bf16.msra.mxu0 %v9559_v40 }
 0x14e   :  { %9298 = vmatpush3.bf16.msra.mxu1 %v10058_v34  ;;  %8648 = vmatprep.mubr.f32.mxu1 %v10103_v31 }
 0x14f   :  { %9110 = vmatprep.mubr.f32.mxu0 %v9990_v7  ;;  %9564 = vmatprep.subr.bf16.mxu0 %v9563_v46 }
 0x150   :  { %9300 = vmatprep.subr.bf16.mxu1 %v10063_v35 }
 0x154   :  { %9111 = vmatmul.mubr.f32.vlgmr.msra.gmra.mrb[12].mxu0 %v9993_v10 }
 0x155   :  { %8649 = vmatmul.mubr.f32.vlgmr.msra.gmra.mrb[0].mxu1 %v10099_v29  ;;  %9566 = vmatpush3.bf16.msra.mxu0 %v9563_v46 }
 0x156   :  { %9302 = vmatpush3.bf16.msra.mxu1 %v10063_v35  ;;  %8655 = vmatprep.mubr.f32.mxu1 %v645_v37 }
 0x157   :  { %9117 = vmatprep.mubr.f32.mxu0 %v9996_v13  ;;  %9568 = vmatprep.subr.bf16.mxu0 %v10095_v20 }
 0x158   :  { %9304 = vmatprep.subr.bf16.mxu1 %v10052_v23 }
 0x15c   :  { %9118 = vmatmul.mubr.f32.vlgmr.msra.gmra.mrb[12].mxu0 %v9999_v14 }
 0x15d   :  { %8656 = vmatmul.mubr.f32.vlgmr.msra.gmra.mrb[0].mxu1 %v655_v36  ;;  %9570 = vmatpush3.bf16.msra.mxu0 %v10095_v20 }
 0x15e   :  { %9306 = vmatpush3.bf16.msra.mxu1 %v10052_v23  ;;  %8662 = vmatprep.mubr.f32.mxu1 %v646_v39 }
 0x15f   :  { %9124 = vmatprep.mubr.f32.mxu0 %v10002_v17  ;;  %9572 = vmatprep.subr.bf16.mxu0 %v9571_v47 }
 0x160   :  { %9308 = vmatprep.subr.bf16.mxu1 %v10069_v45 }
 0x164   :  { %9125 = vmatmul.mubr.f32.vlgmr.msra.gmra.mrb[12].mxu0 %v10005_v18 }
 0x165   :  { %8663 = vmatmul.mubr.f32.vlgmr.msra.gmra.mrb[0].mxu1 %v656_v38  ;;  %9574 = vmatpush3.bf16.msra.mxu0 %v9571_v47 }
 0x166   :  { %9310 = vmatpush3.bf16.msra.mxu1 %v10069_v45  ;;  %8669 = vmatprep.mubr.f32.mxu1 %v10103_v31 }
 0x167   :  { %9131 = vmatprep.mubr.f32.mxu0 %v9990_v7  ;;  %9576 = vmatprep.subr.bf16.mxu0 %v10095_v20 }
 0x168   :  { %9312 = vmatprep.subr.bf16.mxu1 %v10052_v23 }
 0x16b   :  { %v8720_v56 = vpop.f32.mrb[2].mxu0 }
 0x16c   :  { %v1590_v60 = vsel %vm62_vm0, %v8720_v56, 0  ;;  %v1576_v61 = vpop.f32.mrb[3].mxu0  ;;  %9132 = vmatmul.mubr.f32.vlgmr.msra.gmra.mrb[12].mxu0 %v9993_v10 }
 0x16d   :  { %v10145_v62 = vand.u32 4294901760, %v1590_v60  ;;  %v1587_v63 = vsel %vm62_vm0, %v1576_v61, 0  ;;  %8670 = vmatmul.mubr.f32.vlgmr.msra.gmra.mrb[0].mxu1 %v10099_v29  ;;  %9578 = vmatpush3.bf16.msra.mxu0 %v10095_v20 }
 0x16e   :  { %v10150_v0 = vand.u32 4294901760, %v1587_v63  ;;  %9314 = vmatpush3.bf16.msra.mxu1 %v10052_v23  ;;  %8676 = vmatprep.mubr.f32.mxu1 %v10103_v31 }
 0x16f   :  { %v1670_v1 = vsub.f32 %v1590_v60, %v10145_v62  ;;  %9138 = vmatprep.mubr.f32.mxu0 %v9990_v7  ;;  %9604 = vmatprep.subr.bf16.mxu0 %v10139_v57 }
 0x170   :  { %v1660_v4 = vsub.f32 %v1587_v63, %v10150_v0  ;;  %9340 = vmatprep.subr.bf16.mxu1 %v10052_v23 }
 0x171   :  { %v1671_v5 = vand.u32 4294901760, %v1670_v1 }
 0x172   :  { %v1661_v6 = vand.u32 4294901760, %v1660_v4 }
 0x173   :  { %v1672_v8 = vsub.f32 %v1670_v1, %v1671_v5 }
 0x174   :  { %9139 = vmatmul.mubr.f32.vlgmr.msra.gmra.mrb[12].mxu0 %v9993_v10  ;;  %v1662_v11 = vsub.f32 %v1660_v4, %v1661_v6 }
 0x175   :  { %8677 = vmatmul.mubr.f32.vlgmr.msra.gmra.mrb[0].mxu1 %v10099_v29  ;;  %9606 = vmatpush3.bf16.msra.mxu0 %v10139_v57  ;;  %v1673_v15 = vand.u32 4294901760, %v1672_v8 }
 0x176   :  { %9342 = vmatpush3.bf16.msra.mxu1 %v10052_v23  ;;  %9187 = vmatprep.mubr.f32.mxu0 %v10011_v25  ;;  %v1663_v12 = vand.u32 4294901760, %v1662_v11  ;;  %v9619_v25 = vpack.c.bf16 %v7277_v55, %v7270_v54 }
 0x177   :  { %9608 = vmatprep.subr.bf16.mxu0 %v9607_v9  ;;  %9344 = vmatprep.subr.bf16.mxu1 %v10058_v34 }
 0x178   :  { %8725 = vmatprep.mubr.f32.mxu1 %v1663_v12  ;;  %9188 = vmatmul.mubr.f32.vlgmr.msra.gmra.mrb[14].mxu0 %v10013_v26 }
 0x179   :  { %8726 = vmatmul.mubr.f32.vlgmr.msra.gmra.mrb[2].mxu1 %v1673_v15  ;;  %9610 = vmatpush3.bf16.msra.mxu0 %v9607_v9 }
 0x17a   :  { %9346 = vmatpush3.bf16.msra.mxu1 %v10058_v34  ;;  %8732 = vmatprep.mubr.f32.mxu1 %v10150_v0 }
 0x17b   :  { %9194 = vmatprep.mubr.f32.mxu0 %v9990_v7  ;;  %9612 = vmatprep.subr.bf16.mxu0 %v9611_v16 }
 0x17c   :  { %9348 = vmatprep.subr.bf16.mxu1 %v10063_v35 }
 0x180   :  { %9195 = vmatmul.mubr.f32.vlgmr.msra.gmra.mrb[14].mxu0 %v9993_v10 }
 0x181   :  { %8733 = vmatmul.mubr.f32.vlgmr.msra.gmra.mrb[2].mxu1 %v10145_v62  ;;  %9614 = vmatpush3.bf16.msra.mxu0 %v9611_v16 }
 0x182   :  { %9350 = vmatpush3.bf16.msra.mxu1 %v10063_v35  ;;  %8739 = vmatprep.mubr.f32.mxu1 %v1660_v4 }
 0x183   :  { %9201 = vmatprep.mubr.f32.mxu0 %v9996_v13  ;;  %9616 = vmatprep.subr.bf16.mxu0 %v10139_v57 }
 0x184   :  { %9352 = vmatprep.subr.bf16.mxu1 %v10052_v23 }
 0x188   :  { %9202 = vmatmul.mubr.f32.vlgmr.msra.gmra.mrb[14].mxu0 %v9999_v14 }
 0x189   :  { %8740 = vmatmul.mubr.f32.vlgmr.msra.gmra.mrb[2].mxu1 %v1670_v1  ;;  %9618 = vmatpush3.bf16.msra.mxu0 %v10139_v57 }
 0x18a   :  { %9354 = vmatpush3.bf16.msra.mxu1 %v10052_v23  ;;  %8746 = vmatprep.mubr.f32.mxu1 %v1661_v6 }
 0x18b   :  { %9208 = vmatprep.mubr.f32.mxu0 %v10002_v17  ;;  %9620 = vmatprep.subr.bf16.mxu0 %v9619_v25 }
 0x18c   :  { %9356 = vmatprep.subr.bf16.mxu1 %v10069_v45 }
 0x190   :  { %9209 = vmatmul.mubr.f32.vlgmr.msra.gmra.mrb[14].mxu0 %v10005_v18 }
 0x191   :  { %8747 = vmatmul.mubr.f32.vlgmr.msra.gmra.mrb[2].mxu1 %v1671_v5  ;;  %9622 = vmatpush3.bf16.msra.mxu0 %v9619_v25 }
 0x192   :  { %9358 = vmatpush3.bf16.msra.mxu1 %v10069_v45  ;;  %8753 = vmatprep.mubr.f32.mxu1 %v10150_v0 }
 0x193   :  { %9215 = vmatprep.mubr.f32.mxu0 %v9990_v7  ;;  %9624 = vmatprep.subr.bf16.mxu0 %v10139_v57 }
 0x194   :  { %9360 = vmatprep.subr.bf16.mxu1 %v10052_v23 }
 0x197   :  { %v8804_v13 = vpop.f32.mrb[4].mxu0 }
 0x198   :  { %v2606_v14 = vsel %vm62_vm0, %v8804_v13, 0  ;;  %v2592_v17 = vpop.f32.mrb[5].mxu0  ;;  %9216 = vmatmul.mubr.f32.vlgmr.msra.gmra.mrb[14].mxu0 %v9993_v10 }
 0x199   :  { %v2685_v26 = vand.u32 4294901760, %v2606_v14  ;;  %v2603_v18 = vsel %vm62_vm0, %v2592_v17, 0  ;;  %8754 = vmatmul.mubr.f32.vlgmr.msra.gmra.mrb[2].mxu1 %v10145_v62  ;;  %9626 = vmatpush3.bf16.msra.mxu0 %v10139_v57 }
 0x19a   :  { %v2675_v19 = vand.u32 4294901760, %v2603_v18  ;;  %9362 = vmatpush3.bf16.msra.mxu1 %v10052_v23  ;;  %8760 = vmatprep.mubr.f32.mxu1 %v10150_v0 }
 0x19b   :  { %v2686_v20 = vsub.f32 %v2606_v14, %v2685_v26  ;;  %9222 = vmatprep.mubr.f32.mxu0 %v9990_v7  ;;  %9388 = vmatprep.subr.bf16.mxu1 %v10052_v23 }
 0x19c   :  { %v2676_v21 = vsub.f32 %v2603_v18, %v2675_v19 }
 0x19d   :  { %v2687_v22 = vand.u32 4294901760, %v2686_v20 }
 0x19e   :  { %v2677_v24 = vand.u32 4294901760, %v2676_v21 }
 0x19f   :  { %v2688_v27 = vsub.f32 %v2686_v20, %v2687_v22 }
 0x1a0   :  { %9223 = vmatmul.mubr.f32.vlgmr.msra.gmra.mrb[14].mxu0 %v9993_v10  ;;  %v2678_v28 = vsub.f32 %v2676_v21, %v2677_v24 }
 0x1a1   :  { %8761 = vmatmul.mubr.f32.vlgmr.msra.gmra.mrb[2].mxu1 %v10145_v62  ;;  %v2689_v30 = vand.u32 4294901760, %v2688_v27 }
 0x1a2   :  { %9390 = vmatpush3.bf16.msra.mxu1 %v10052_v23  ;;  %v2679_v29 = vand.u32 4294901760, %v2678_v28 }
 0x1a3   :  { %9392 = vmatprep.subr.bf16.mxu1 %v10058_v34 }
 0x1a4   :  { %8809 = vmatprep.mubr.f32.mxu1 %v2679_v29 }
 0x1a5   :  { %8810 = vmatmul.mubr.f32.vlgmr.msra.gmra.mrb[4].mxu1 %v2689_v30 }
 0x1a6   :  { %9394 = vmatpush3.bf16.msra.mxu1 %v10058_v34  ;;  %8816 = vmatprep.mubr.f32.mxu1 %v2675_v19 }
 0x1a7   :  { %9396 = vmatprep.subr.bf16.mxu1 %v10063_v35 }
 0x1ad   :  { %8817 = vmatmul.mubr.f32.vlgmr.msra.gmra.mrb[4].mxu1 %v2685_v26 }
 0x1ae   :  { %9398 = vmatpush3.bf16.msra.mxu1 %v10063_v35  ;;  %8823 = vmatprep.mubr.f32.mxu1 %v2676_v21 }
 0x1af   :  { %9400 = vmatprep.subr.bf16.mxu1 %v10052_v23 }
 0x1b5   :  { %8824 = vmatmul.mubr.f32.vlgmr.msra.gmra.mrb[4].mxu1 %v2686_v20 }
 0x1b6   :  { %9402 = vmatpush3.bf16.msra.mxu1 %v10052_v23  ;;  %8830 = vmatprep.mubr.f32.mxu1 %v2677_v24 }
 0x1b7   :  { %9404 = vmatprep.subr.bf16.mxu1 %v10069_v45 }
 0x1bd   :  { %8831 = vmatmul.mubr.f32.vlgmr.msra.gmra.mrb[4].mxu1 %v2687_v22 }
 0x1be   :  { %9406 = vmatpush3.bf16.msra.mxu1 %v10069_v45  ;;  %8837 = vmatprep.mubr.f32.mxu1 %v2675_v19 }
 0x1bf   :  { %9408 = vmatprep.subr.bf16.mxu1 %v10052_v23 }
 0x1c3   :  { %v8888_v7 = vpop.f32.mrb[6].mxu0 }
 0x1c4   :  { %v3622_v10 = vsel %vm62_vm0, %v8888_v7, 0  ;;  %v3608_v31 = vpop.f32.mrb[7].mxu0 }
 0x1c5   :  { %v3701_v32 = vand.u32 4294901760, %v3622_v10  ;;  %v3619_v33 = vsel %vm62_vm0, %v3608_v31, 0  ;;  %8838 = vmatmul.mubr.f32.vlgmr.msra.gmra.mrb[4].mxu1 %v2685_v26 }
 0x1c6   :  { %v3691_v36 = vand.u32 4294901760, %v3619_v33  ;;  %9410 = vmatpush3.bf16.msra.mxu1 %v10052_v23  ;;  %8844 = vmatprep.mubr.f32.mxu1 %v2675_v19 }
 0x1c7   :  { %v3702_v37 = vsub.f32 %v3622_v10, %v3701_v32  ;;  %9436 = vmatprep.subr.bf16.mxu1 %v10052_v23 }
 0x1c8   :  { %v3692_v38 = vsub.f32 %v3619_v33, %v3691_v36 }
 0x1c9   :  { %v3703_v39 = vand.u32 4294901760, %v3702_v37 }
 0x1ca   :  { %v3693_v40 = vand.u32 4294901760, %v3692_v38 }
 0x1cb   :  { %v3704_v41 = vsub.f32 %v3702_v37, %v3703_v39 }
 0x1cc   :  { %v3694_v42 = vsub.f32 %v3692_v38, %v3693_v40 }
 0x1cd   :  { %8845 = vmatmul.mubr.f32.vlgmr.msra.gmra.mrb[4].mxu1 %v2685_v26  ;;  %v3705_v44 = vand.u32 4294901760, %v3704_v41 }
 0x1ce   :  { %9438 = vmatpush3.bf16.msra.mxu1 %v10052_v23  ;;  %v3695_v43 = vand.u32 4294901760, %v3694_v42 }
 0x1cf   :  { %9440 = vmatprep.subr.bf16.mxu1 %v10058_v34 }
 0x1d0   :  { %8893 = vmatprep.mubr.f32.mxu1 %v3695_v43 }
 0x1d1   :  { %8894 = vmatmul.mubr.f32.vlgmr.msra.gmra.mrb[6].mxu1 %v3705_v44 }
 0x1d2   :  { %9442 = vmatpush3.bf16.msra.mxu1 %v10058_v34  ;;  %8900 = vmatprep.mubr.f32.mxu1 %v3691_v36 }
 0x1d3   :  { %9444 = vmatprep.subr.bf16.mxu1 %v10063_v35 }
 0x1d9   :  { %8901 = vmatmul.mubr.f32.vlgmr.msra.gmra.mrb[6].mxu1 %v3701_v32 }
 0x1da   :  { %9446 = vmatpush3.bf16.msra.mxu1 %v10063_v35  ;;  %8907 = vmatprep.mubr.f32.mxu1 %v3692_v38 }
 0x1db   :  { %9448 = vmatprep.subr.bf16.mxu1 %v10052_v23 }
 0x1e1   :  { %8908 = vmatmul.mubr.f32.vlgmr.msra.gmra.mrb[6].mxu1 %v3702_v37 }
 0x1e2   :  { %9450 = vmatpush3.bf16.msra.mxu1 %v10052_v23  ;;  %8914 = vmatprep.mubr.f32.mxu1 %v3693_v40 }
 0x1e3   :  { %9452 = vmatprep.subr.bf16.mxu1 %v10069_v45 }
 0x1e9   :  { %8915 = vmatmul.mubr.f32.vlgmr.msra.gmra.mrb[6].mxu1 %v3703_v39 }
 0x1ea   :  { %9454 = vmatpush3.bf16.msra.mxu1 %v10069_v45  ;;  %8921 = vmatprep.mubr.f32.mxu1 %v3691_v36 }
 0x1eb   :  { %9456 = vmatprep.subr.bf16.mxu1 %v10052_v23 }
 0x1ef   :  { %v8972_v46 = vpop.f32.mrb[8].mxu0 }
 0x1f0   :  { %v4638_v47 = vsel %vm62_vm0, %v8972_v46, 0  ;;  %v4624_v48 = vpop.f32.mrb[9].mxu0 }
 0x1f1   :  { %v4717_v49 = vand.u32 4294901760, %v4638_v47  ;;  %v4635_v50 = vsel %vm62_vm0, %v4624_v48, 0  ;;  %8922 = vmatmul.mubr.f32.vlgmr.msra.gmra.mrb[6].mxu1 %v3701_v32 }
 0x1f2   :  { %v4707_v51 = vand.u32 4294901760, %v4635_v50  ;;  %9458 = vmatpush3.bf16.msra.mxu1 %v10052_v23  ;;  %8928 = vmatprep.mubr.f32.mxu1 %v3691_v36 }
 0x1f3   :  { %v4718_v52 = vsub.f32 %v4638_v47, %v4717_v49  ;;  %9484 = vmatprep.subr.bf16.mxu1 %v10052_v23 }
 0x1f4   :  { %v4708_v53 = vsub.f32 %v4635_v50, %v4707_v51 }
 0x1f5   :  { %v4719_v54 = vand.u32 4294901760, %v4718_v52 }
 0x1f6   :  { %v4709_v55 = vand.u32 4294901760, %v4708_v53 }
 0x1f7   :  { %v4720_v56 = vsub.f32 %v4718_v52, %v4719_v54 }
 0x1f8   :  { %v4710_v57 = vsub.f32 %v4708_v53, %v4709_v55 }
 0x1f9   :  { %8929 = vmatmul.mubr.f32.vlgmr.msra.gmra.mrb[6].mxu1 %v3701_v32  ;;  %v4721_v59 = vand.u32 4294901760, %v4720_v56 }
 0x1fa   :  { %9486 = vmatpush3.bf16.msra.mxu1 %v10052_v23  ;;  %v4711_v58 = vand.u32 4294901760, %v4710_v57 }
 0x1fb   :  { %9488 = vmatprep.subr.bf16.mxu1 %v10058_v34 }
 0x1fc   :  { %8977 = vmatprep.mubr.f32.mxu1 %v4711_v58 }
 0x1fd   :  { %8978 = vmatmul.mubr.f32.vlgmr.msra.gmra.mrb[8].mxu1 %v4721_v59 }
 0x1fe   :  { %9490 = vmatpush3.bf16.msra.mxu1 %v10058_v34  ;;  %8984 = vmatprep.mubr.f32.mxu1 %v4707_v51 }
 0x1ff   :  { %9492 = vmatprep.subr.bf16.mxu1 %v10063_v35 }
 0x205   :  { %8985 = vmatmul.mubr.f32.vlgmr.msra.gmra.mrb[8].mxu1 %v4717_v49 }
 0x206   :  { %9494 = vmatpush3.bf16.msra.mxu1 %v10063_v35  ;;  %8991 = vmatprep.mubr.f32.mxu1 %v4708_v53 }
 0x207   :  { %9496 = vmatprep.subr.bf16.mxu1 %v10052_v23 }
 0x20d   :  { %8992 = vmatmul.mubr.f32.vlgmr.msra.gmra.mrb[8].mxu1 %v4718_v52 }
 0x20e   :  { %9498 = vmatpush3.bf16.msra.mxu1 %v10052_v23  ;;  %8998 = vmatprep.mubr.f32.mxu1 %v4709_v55 }
 0x20f   :  { %9500 = vmatprep.subr.bf16.mxu1 %v10069_v45 }
 0x215   :  { %8999 = vmatmul.mubr.f32.vlgmr.msra.gmra.mrb[8].mxu1 %v4719_v54 }
 0x216   :  { %9502 = vmatpush3.bf16.msra.mxu1 %v10069_v45  ;;  %9005 = vmatprep.mubr.f32.mxu1 %v4707_v51 }
 0x217   :  { %9504 = vmatprep.subr.bf16.mxu1 %v10052_v23 }
 0x21b   :  { %v9056_v60 = vpop.f32.mrb[10].mxu0 }
 0x21c   :  { %v5654_v61 = vsel %vm62_vm0, %v9056_v60, 0  ;;  %v5640_v62 = vpop.f32.mrb[11].mxu0 }
 0x21d   :  { %v5733_v63 = vand.u32 4294901760, %v5654_v61  ;;  %v5651_v0 = vsel %vm62_vm0, %v5640_v62, 0  ;;  %9006 = vmatmul.mubr.f32.vlgmr.msra.gmra.mrb[8].mxu1 %v4717_v49 }
 0x21e   :  { %v5723_v1 = vand.u32 4294901760, %v5651_v0  ;;  %9506 = vmatpush3.bf16.msra.mxu1 %v10052_v23  ;;  %9012 = vmatprep.mubr.f32.mxu1 %v4707_v51 }
 0x21f   :  { %v5734_v2 = vsub.f32 %v5654_v61, %v5733_v63  ;;  %9532 = vmatprep.subr.bf16.mxu1 %v10052_v23 }
 0x220   :  { %v5724_v3 = vsub.f32 %v5651_v0, %v5723_v1 }
 0x221   :  { %v5735_v4 = vand.u32 4294901760, %v5734_v2 }
 0x222   :  { %v5725_v5 = vand.u32 4294901760, %v5724_v3 }
 0x223   :  { %v5736_v6 = vsub.f32 %v5734_v2, %v5735_v4 }
 0x224   :  { %v5726_v8 = vsub.f32 %v5724_v3, %v5725_v5 }
 0x225   :  { %9013 = vmatmul.mubr.f32.vlgmr.msra.gmra.mrb[8].mxu1 %v4717_v49  ;;  %v5737_v11 = vand.u32 4294901760, %v5736_v6 }
 0x226   :  { %9534 = vmatpush3.bf16.msra.mxu1 %v10052_v23  ;;  %v5727_v9 = vand.u32 4294901760, %v5726_v8 }
 0x227   :  { %9536 = vmatprep.subr.bf16.mxu1 %v10058_v34 }
 0x228   :  { %9061 = vmatprep.mubr.f32.mxu1 %v5727_v9 }
 0x229   :  { %9062 = vmatmul.mubr.f32.vlgmr.msra.gmra.mrb[10].mxu1 %v5737_v11 }
 0x22a   :  { %9538 = vmatpush3.bf16.msra.mxu1 %v10058_v34  ;;  %9068 = vmatprep.mubr.f32.mxu1 %v5723_v1 }
 0x22b   :  { %9540 = vmatprep.subr.bf16.mxu1 %v10063_v35 }
 0x231   :  { %9069 = vmatmul.mubr.f32.vlgmr.msra.gmra.mrb[10].mxu1 %v5733_v63 }
 0x232   :  { %9542 = vmatpush3.bf16.msra.mxu1 %v10063_v35  ;;  %9075 = vmatprep.mubr.f32.mxu1 %v5724_v3 }
 0x233   :  { %9544 = vmatprep.subr.bf16.mxu1 %v10052_v23 }
 0x239   :  { %9076 = vmatmul.mubr.f32.vlgmr.msra.gmra.mrb[10].mxu1 %v5734_v2 }
 0x23a   :  { %9546 = vmatpush3.bf16.msra.mxu1 %v10052_v23  ;;  %9082 = vmatprep.mubr.f32.mxu1 %v5725_v5 }
 0x23b   :  { %9548 = vmatprep.subr.bf16.mxu1 %v10069_v45 }
 0x241   :  { %9083 = vmatmul.mubr.f32.vlgmr.msra.gmra.mrb[10].mxu1 %v5735_v4 }
 0x242   :  { %9550 = vmatpush3.bf16.msra.mxu1 %v10069_v45  ;;  %9089 = vmatprep.mubr.f32.mxu1 %v5723_v1 }
 0x243   :  { %9552 = vmatprep.subr.bf16.mxu1 %v10052_v23 }
 0x247   :  { %v9140_v12 = vpop.f32.mrb[12].mxu0 }
 0x248   :  { %v6670_v15 = vsel %vm62_vm0, %v9140_v12, 0  ;;  %v8678_v16 = vpop.f32.mrb[0].mxu1  ;;  %v6656_v25 = vpop.f32.mrb[13].mxu0 }
 0x249   :  { %v6749_v13 = vand.u32 4294901760, %v6670_v15  ;;  %1080 = vst.msk [vmem:[#allocation8 + $0x8] sm:$0xff] %vm62_vm0, %v8678_v16  ;;  %v6667_v14 = vsel %vm62_vm0, %v6656_v25, 0  ;;  %v1069_v17 = vpop.f32.mrb[1].mxu1  ;;  %9090 = vmatmul.mubr.f32.vlgmr.msra.gmra.mrb[10].mxu1 %v5733_v63 }
 0x24a   :  { %v6739_v26 = vand.u32 4294901760, %v6667_v14  ;;  %1079 = vst.msk [vmem:[#allocation8] sm:$0xff] %vm62_vm0, %v1069_v17  ;;  %9554 = vmatpush3.bf16.msra.mxu1 %v10052_v23  ;;  %9096 = vmatprep.mubr.f32.mxu1 %v5723_v1 }
 0x24b   :  { %v6750_v18 = vsub.f32 %v6670_v15, %v6749_v13  ;;  %9580 = vmatprep.subr.bf16.mxu1 %v10052_v23 }
 0x24c   :  { %v6740_v19 = vsub.f32 %v6667_v14, %v6739_v26 }
 0x24d   :  { %v6751_v20 = vand.u32 4294901760, %v6750_v18 }
 0x24e   :  { %v6741_v21 = vand.u32 4294901760, %v6740_v19 }
 0x24f   :  { %v6752_v22 = vsub.f32 %v6750_v18, %v6751_v20 }
 0x250   :  { %v6742_v24 = vsub.f32 %v6740_v19, %v6741_v21 }
 0x251   :  { %9097 = vmatmul.mubr.f32.vlgmr.msra.gmra.mrb[10].mxu1 %v5733_v63  ;;  %v6753_v28 = vand.u32 4294901760, %v6752_v22 }
 0x252   :  { %9582 = vmatpush3.bf16.msra.mxu1 %v10052_v23  ;;  %v6743_v27 = vand.u32 4294901760, %v6742_v24 }
 0x253   :  { %9584 = vmatprep.subr.bf16.mxu1 %v10058_v34 }
 0x254   :  { %9145 = vmatprep.mubr.f32.mxu1 %v6743_v27 }
 0x255   :  { %9146 = vmatmul.mubr.f32.vlgmr.msra.gmra.mrb[12].mxu1 %v6753_v28 }
 0x256   :  { %9586 = vmatpush3.bf16.msra.mxu1 %v10058_v34  ;;  %9152 = vmatprep.mubr.f32.mxu1 %v6739_v26 }
 0x257   :  { %9588 = vmatprep.subr.bf16.mxu1 %v10063_v35 }
 0x25d   :  { %9153 = vmatmul.mubr.f32.vlgmr.msra.gmra.mrb[12].mxu1 %v6749_v13 }
 0x25e   :  { %9590 = vmatpush3.bf16.msra.mxu1 %v10063_v35  ;;  %9159 = vmatprep.mubr.f32.mxu1 %v6740_v19 }
 0x25f   :  { %9592 = vmatprep.subr.bf16.mxu1 %v10052_v23 }
 0x265   :  { %9160 = vmatmul.mubr.f32.vlgmr.msra.gmra.mrb[12].mxu1 %v6750_v18 }
 0x266   :  { %9594 = vmatpush3.bf16.msra.mxu1 %v10052_v23  ;;  %9166 = vmatprep.mubr.f32.mxu1 %v6741_v21 }
 0x267   :  { %9596 = vmatprep.subr.bf16.mxu1 %v10069_v45 }
 0x26d   :  { %9167 = vmatmul.mubr.f32.vlgmr.msra.gmra.mrb[12].mxu1 %v6751_v20 }
 0x26e   :  { %9598 = vmatpush3.bf16.msra.mxu1 %v10069_v45  ;;  %9173 = vmatprep.mubr.f32.mxu1 %v6739_v26 }
 0x26f   :  { %9600 = vmatprep.subr.bf16.mxu1 %v10052_v23 }
 0x273   :  { %v9224_v29 = vpop.f32.mrb[14].mxu0 }
 0x274   :  { %v7686_v30 = vsel %vm62_vm0, %v9224_v29, 0  ;;  %v8762_v7 = vpop.f32.mrb[2].mxu1  ;;  %v7672_v10 = vpop.f32.mrb[15].mxu0 }
 0x275   :  { %v7765_v31 = vand.u32 4294901760, %v7686_v30  ;;  %2096 = vst.msk [vmem:[#allocation8 + $0x18] sm:$0xff] %vm62_vm0, %v8762_v7  ;;  %v7683_v32 = vsel %vm62_vm0, %v7672_v10, 0  ;;  %v2084_v33 = vpop.f32.mrb[3].mxu1  ;;  %9174 = vmatmul.mubr.f32.vlgmr.msra.gmra.mrb[12].mxu1 %v6749_v13 }
 0x276   :  { %v7755_v36 = vand.u32 4294901760, %v7683_v32  ;;  %2095 = vst.msk [vmem:[#allocation8 + $0x10] sm:$0xff] %vm62_vm0, %v2084_v33  ;;  %9602 = vmatpush3.bf16.msra.mxu1 %v10052_v23  ;;  %9180 = vmatprep.mubr.f32.mxu1 %v6739_v26 }
 0x277   :  { %v7766_v37 = vsub.f32 %v7686_v30, %v7765_v31  ;;  %9628 = vmatprep.subr.bf16.mxu1 %v10052_v23 }
 0x278   :  { %v7756_v38 = vsub.f32 %v7683_v32, %v7755_v36 }
 0x279   :  { %v7767_v39 = vand.u32 4294901760, %v7766_v37 }
 0x27a   :  { %v7757_v40 = vand.u32 4294901760, %v7756_v38 }
 0x27b   :  { %v7768_v41 = vsub.f32 %v7766_v37, %v7767_v39 }
 0x27c   :  { %v7758_v42 = vsub.f32 %v7756_v38, %v7757_v40 }
 0x27d   :  { %9181 = vmatmul.mubr.f32.vlgmr.msra.gmra.mrb[12].mxu1 %v6749_v13  ;;  %v7769_v44 = vand.u32 4294901760, %v7768_v41 }
 0x27e   :  { %9630 = vmatpush3.bf16.msra.mxu1 %v10052_v23  ;;  %v7759_v43 = vand.u32 4294901760, %v7758_v42 }
 0x27f   :  { %9632 = vmatprep.subr.bf16.mxu1 %v10058_v34 }
 0x280   :  { %9229 = vmatprep.mubr.f32.mxu1 %v7759_v43 }
 0x281   :  { %9230 = vmatmul.mubr.f32.vlgmr.msra.gmra.mrb[14].mxu1 %v7769_v44 }
 0x282   :  { %9634 = vmatpush3.bf16.msra.mxu1 %v10058_v34  ;;  %9236 = vmatprep.mubr.f32.mxu1 %v7755_v36 }
 0x283   :  { %9636 = vmatprep.subr.bf16.mxu1 %v10063_v35 }
 0x289   :  { %9237 = vmatmul.mubr.f32.vlgmr.msra.gmra.mrb[14].mxu1 %v7765_v31 }
 0x28a   :  { %9638 = vmatpush3.bf16.msra.mxu1 %v10063_v35  ;;  %9243 = vmatprep.mubr.f32.mxu1 %v7756_v38 }
 0x28b   :  { %9640 = vmatprep.subr.bf16.mxu1 %v10052_v23 }
 0x291   :  { %9244 = vmatmul.mubr.f32.vlgmr.msra.gmra.mrb[14].mxu1 %v7766_v37 }
 0x292   :  { %9642 = vmatpush3.bf16.msra.mxu1 %v10052_v23  ;;  %9250 = vmatprep.mubr.f32.mxu1 %v7757_v40 }
 0x293   :  { %9644 = vmatprep.subr.bf16.mxu1 %v10069_v45 }
 0x299   :  { %9251 = vmatmul.mubr.f32.vlgmr.msra.gmra.mrb[14].mxu1 %v7767_v39 }
 0x29a   :  { %9646 = vmatpush3.bf16.msra.mxu1 %v10069_v45  ;;  %9257 = vmatprep.mubr.f32.mxu1 %v7755_v36 }
 0x29b   :  { %9648 = vmatprep.subr.bf16.mxu1 %v10052_v23 }
 0x2a0   :  { %v8846_v34 = vpop.f32.mrb[4].mxu1 }
 0x2a1   :  { %3112 = vst.msk [vmem:[#allocation8 + $0x28] sm:$0xff] %vm62_vm0, %v8846_v34  ;;  %v3100_v46 = vpop.f32.mrb[5].mxu1  ;;  %9258 = vmatmul.mubr.f32.vlgmr.msra.gmra.mrb[14].mxu1 %v7765_v31 }
 0x2a2   :  { %3111 = vst.msk [vmem:[#allocation8 + $0x20] sm:$0xff] %vm62_vm0, %v3100_v46  ;;  %9650 = vmatpush3.bf16.msra.mxu1 %v10052_v23  ;;  %9264 = vmatprep.mubr.f32.mxu1 %v7755_v36 }
 0x2a9   :  { %9265 = vmatmul.mubr.f32.vlgmr.msra.gmra.mrb[14].mxu1 %v7765_v31 }
 0x2cc   :  { %v8930_v35 = vpop.f32.mrb[6].mxu1 }
 0x2cd   :  { %4128 = vst.msk [vmem:[#allocation8 + $0x38] sm:$0xff] %vm62_vm0, %v8930_v35  ;;  %v4116_v47 = vpop.f32.mrb[7].mxu1 }
 0x2ce   :  { %4127 = vst.msk [vmem:[#allocation8 + $0x30] sm:$0xff] %vm62_vm0, %v4116_v47 }
 0x2f8   :  { %v9014_v45 = vpop.f32.mrb[8].mxu1 }
 0x2f9   :  { %5144 = vst.msk [vmem:[#allocation8 + $0x48] sm:$0xff] %vm62_vm0, %v9014_v45  ;;  %v5132_v48 = vpop.f32.mrb[9].mxu1 }
 0x2fa   :  { %5143 = vst.msk [vmem:[#allocation8 + $0x40] sm:$0xff] %vm62_vm0, %v5132_v48 }
 0x324   :  { %v9098_v49 = vpop.f32.mrb[10].mxu1 }
 0x325   :  { %6160 = vst.msk [vmem:[#allocation8 + $0x58] sm:$0xff] %vm62_vm0, %v9098_v49  ;;  %v6148_v50 = vpop.f32.mrb[11].mxu1 }
 0x326   :  { %6159 = vst.msk [vmem:[#allocation8 + $0x50] sm:$0xff] %vm62_vm0, %v6148_v50 }
 0x350   :  { %v9182_v23 = vpop.f32.mrb[12].mxu1 }
 0x351   :  { %7176 = vst.msk [vmem:[#allocation8 + $0x68] sm:$0xff] %vm62_vm0, %v9182_v23  ;;  %v7164_v51 = vpop.f32.mrb[13].mxu1 }
 0x352   :  { %7175 = vst.msk [vmem:[#allocation8 + $0x60] sm:$0xff] %vm62_vm0, %v7164_v51 }
 0x37c   :  { %v9266_v52 = vpop.f32.mrb[14].mxu1 }
 0x37d   :  { %8192 = vst.msk [vmem:[#allocation8 + $0x78] sm:$0xff] %vm62_vm0, %v9266_v52  ;;  %v8180_v53 = vpop.f32.mrb[15].mxu1 }
 0x37e   :  { %8191 = vst.msk [vmem:[#allocation8 + $0x70] sm:$0xff] %vm62_vm0, %v8180_v53 }
 0x37f   :  { %9894 = shalt.err (!%p9891_p0)
}
 0x380   :  { %s9895_s27 = scalar_lea.hbm %s10315_s3, 2048 }
 0x381   :  { %p9896_p1 = scmp.ne.s32.totalorder %s10315_s3, %s9895_s27  ;;  %p9899_p2 = scmp.lt.u32.totalorder %s9895_s27, %s10315_s3 }
 0x383   :  { %p9901_p3 = pnand %p9899_p2, %p9896_p1 }
 0x385   :  { %9904 = shalt.err (!%p9901_p3)
}
 0x386   :  { %8204 = dma.vmem_to_hbm [thread:$0]  %s8199_s21, 2048, %s10315_s3, [#allocation4], %s9913_s24, %s9913_s24, %s9914_s25  }
 0x387   :  { %9909 = dma.done.wait [#allocation4], 2048  }
 0x388   :  { %9910 = vsyncadd [#allocation4], 4294965248 }
 0x389   :  { %8208 = vsyncpa [#allocation3], 1 }
 0x38a   :  { %8209 = vsyncpa [#allocation6], 1 }
 0x38b   :  { %8210 = vsyncpa [#allocation4], 1 }

</bundles_post_ra>
